<compile_context>
chip_gen: v7x
topology: tpu7x:2x2x1
jax: 0.10.0
libtpu: 0.0.40
codegen_flags: <defaults>
</compile_context>

<pallas_src>
import functools

import jax
import jax.numpy as jnp
from jax.experimental import pallas as pl
from jax.experimental.pallas import tpu as pltpu


def _cox_affine_kernel(x_ref, s_ref, b_ref, o_ref, *, valid_k):
    # x_ref: (tn, 4*tg) VMEM  -- natural row-major layout, contiguous DMA
    # s_ref: (4*tg, tg) VMEM  -- resident comb matrix, S[4j+k, j] = w[k]
    # b_ref: (1,) SMEM        -- bias scalar
    # o_ref: (tn, tg)  VMEM
    x = x_ref[...]
    if valid_k is not None:
        # Last gene block is ragged: Pallas leaves the out-of-range tail of the
        # input block uninitialized; zero it so garbage (possibly NaN/Inf)
        # cannot leak through the MXU accumulation into valid output columns.
        is_last = pl.program_id(1) == pl.num_programs(1) - 1
        col = jax.lax.broadcasted_iota(jnp.int32, x.shape, 1)
        kmax = jnp.where(is_last, valid_k, x.shape[1])
        x = jnp.where(col < kmax, x, 0.0)
    acc = jnp.dot(x, s_ref[...],
                  preferred_element_type=jnp.float32,
                  precision=jax.lax.Precision.HIGHEST)
    o_ref[...] = (acc + b_ref[0]).astype(o_ref.dtype)


def _mxu_gene_tile_default():
    """Gene sub-tile (matmul N): 256 for v6e/v7x-class MXUs, 128 for v5e."""
    try:
        kind = jax.devices()[0].device_kind.lower()
    except Exception:
        return 256
    if "v5e" in kind or "v5 lite" in kind or "v5lite" in kind:
        return 128
    return 256


def _pick_tiles(n_samples, gene_num, gene_tile_max, sample_tile_max):
    tn = n_samples if n_samples <= sample_tile_max else sample_tile_max
    sample_steps = -(-n_samples // tn)
    if gene_num <= gene_tile_max:
        tg = gene_num
        # Grid-step floor: a (1,1) grid disables double-buffering and idles one
        # v7x TensorCore.  If the gene axis is big enough, split it into >=2
        # 128-aligned tiles (layout-legal even when gene_num % tg != 0, the
        # kernel masks the ragged tail).
        if sample_steps == 1 and gene_num >= 256:
            half = ((gene_num + 1) // 2 + 127) // 128 * 128
            if 128 <= half < gene_num:
                tg = half
    else:
        tg = gene_tile_max
    return tn, tg


def cox_affine_forward(x, weight, bias, gene_num, *,
                       gene_tile=None, sample_tile=512):
    """x: (n_samples, gene_num*4); weight: (4,) or (1,4); bias: (1,) or ()."""
    n = x.shape[0]
    weight = jnp.asarray(weight).reshape(-1).astype(x.dtype)   # accept (1,4) too
    bias = jnp.asarray(bias).reshape(-1).astype(jnp.float32)

    if gene_tile is None:
        gene_tile = _mxu_gene_tile_default()
    tn, tg = _pick_tiles(n, gene_num, gene_tile, sample_tile)
    grid = (pl.cdiv(n, tn), pl.cdiv(gene_num, tg))

    # Comb matrix: S[4*j + k, j] = w[k], shape (4*tg, tg).  Built once, stays
    # resident in VMEM across the whole grid (index_map is constant).
    eye = jnp.eye(tg, dtype=x.dtype)
    comb = (eye[:, None, :] * weight[None, :, None]).reshape(4 * tg, tg)

    rem_g = gene_num % tg
    valid_k = 4 * rem_g if rem_g != 0 else None
    kernel = functools.partial(_cox_affine_kernel, valid_k=valid_k)

    itemsize = jnp.dtype(x.dtype).itemsize
    cost = pl.CostEstimate(
        flops=2 * n * gene_num * 4 * tg,           # MXU work actually issued
        transcendentals=0,
        bytes_accessed=(5 * n * gene_num + 4 * tg * tg) * itemsize)

    out = pl.pallas_call(
        kernel,
        out_shape=jax.ShapeDtypeStruct((n, gene_num), x.dtype),
        grid=grid,
        in_specs=[
            # natural layout: block g covers genes [g*tg, (g+1)*tg) == columns
            # [g*4*tg, (g+1)*4*tg) of x -> fully contiguous row chunks.
            pl.BlockSpec((tn, 4 * tg), lambda i, g: (i, g)),
            pl.BlockSpec((4 * tg, tg), lambda i, g: (0, 0)),     # resident comb
            pl.BlockSpec(memory_space=pltpu.MemorySpace.SMEM),   # bias
        ],
        out_specs=pl.BlockSpec((tn, tg), lambda i, g: (i, g)),
        compiler_params=pltpu.CompilerParams(
            dimension_semantics=("parallel", "parallel"),
            vmem_limit_bytes=32 * 1024 * 1024,
        ),
        cost_estimate=cost,
    )(x, comb, bias)

    # torch's .squeeze() removes every size-1 dim (n_samples==1 or gene_num==1
    # collapse the same way here); for n>1, gene_num>1 this is (n, gene_num).
    return jnp.squeeze(out)


if __name__ == "__main__":
    key = jax.random.PRNGKey(0)
    kx, kw, kb = jax.random.split(key, 3)

    n_samples = 2
    gene_num = 256                            # in_dim2
    x = jax.random.normal(kx, (n_samples, gene_num * 4), dtype=jnp.float32)

    # deterministic init mimicking nn.Linear(4, 1) (uniform(-1/sqrt(4), 1/sqrt(4)))
    bound = 1.0 / (4.0 ** 0.5)
    weight = jax.random.uniform(kw, (4,), jnp.float32, -bound, bound)
    bias = jax.random.uniform(kb, (1,), jnp.float32, -bound, bound)

    fwd = jax.jit(functools.partial(cox_affine_forward, gene_num=gene_num))
    out = jax.block_until_ready(fwd(x, weight, bias))

    # pure-JAX reference of the PyTorch forward
    # TODO(synk): x.requires_grad_() is autograd bookkeeping with no effect on
    # the forward values; it has no Pallas equivalent and is intentionally omitted.
    ref = jnp.einsum("ngk,k->ng", x.reshape(n_samples, gene_num, 4), weight) + bias[0]
    assert out.shape == (n_samples, gene_num)
    assert jnp.allclose(out, ref, atol=1e-4, rtol=1e-4)

    print("KERNEL_OK")
</pallas_src>

<mosaic_0001>
module attributes {stable_mosaic.version = 11 : i64} {
  func.func @_cox_affine_kernel(%arg0: i32, %arg1: i32, %arg2: memref<2x512xf32, #tpu.memory_space<vmem>>, %arg3: memref<512x128xf32, #tpu.memory_space<vmem>>, %arg4: memref<1xf32, #tpu.memory_space<smem>>, %arg5: memref<2x128xf32, #tpu.memory_space<vmem>>) attributes {dimension_semantics = [#tpu.dimension_semantics<parallel>, #tpu.dimension_semantics<parallel>], iteration_bounds = array<i64: 1, 2>, scalar_prefetch = 0 : i64, scratch_operands = 0 : i64, tpu.core_type = #tpu.core_type<tc>, window_params = [{transform_indices = @transform_0, window_bounds = array<i64: 2, 512>}, {pipeline_mode = #tpu.pipeline_mode<synchronous>, transform_indices = @transform_1, window_bounds = array<i64: 512, 128>}, {transform_indices = @transform_2, window_bounds = array<i64: 1>}, {transform_indices = @transform_3, window_bounds = array<i64: 2, 128>}]} {
    %c0 = arith.constant 0 : index
    %c0_0 = arith.constant 0 : index
    %0 = vector.load %arg2[%c0, %c0_0] : memref<2x512xf32, #tpu.memory_space<vmem>>, vector<2x512xf32>
    %c0_1 = arith.constant 0 : index
    %c0_2 = arith.constant 0 : index
    %1 = vector.load %arg3[%c0_1, %c0_2] : memref<512x128xf32, #tpu.memory_space<vmem>>, vector<512x128xf32>
    %cst = arith.constant dense<0.000000e+00> : vector<2x128xf32>
    %2 = tpu.matmul %0, %1, %cst {dimension_numbers = #tpu.dot_dimension_numbers<[1], [0], [0], [1], [0, 0, 1, 1], [], []>, precision = #tpu.contract_precision<fp32>} : vector<2x512xf32>, vector<512x128xf32>, vector<2x128xf32> -> vector<2x128xf32>
    %c0_3 = arith.constant 0 : index
    %3 = memref.load %arg4[%c0_3] : memref<1xf32, #tpu.memory_space<smem>>
    %4 = vector.broadcast %3 : f32 to vector<2x128xf32>
    %5 = arith.addf %2, %4 : vector<2x128xf32>
    %c0_4 = arith.constant 0 : index
    %c0_5 = arith.constant 0 : index
    %6 = vector.load %arg5[%c0_4, %c0_5] : memref<2x128xf32, #tpu.memory_space<vmem>>, vector<2x128xf32>
    tpu.vector_store %arg5[%c0_4, %c0_5], %5 {strides = array<i32>} : memref<2x128xf32, #tpu.memory_space<vmem>>, vector<2x128xf32>,
    return
  }
  func.func @transform_0(%arg0: i32, %arg1: i32) -> (i32, i32) {
    %c0_i32 = arith.constant 0 : i32
    return %arg0, %arg1 : i32, i32
  }
  func.func @transform_1(%arg0: i32, %arg1: i32) -> (i32, i32) {
    %c0_i32 = arith.constant 0 : i32
    %c0_i32_0 = arith.constant 0 : i32
    %c0_i32_1 = arith.constant 0 : i32
    return %c0_i32, %c0_i32_0 : i32, i32
  }
  func.func @transform_2(%arg0: i32, %arg1: i32) -> i32 {
    %c0_i32 = arith.constant 0 : i32
    %c0_i32_0 = arith.constant 0 : i32
    return %c0_i32 : i32
  }
  func.func @transform_3(%arg0: i32, %arg1: i32) -> (i32, i32) {
    %c0_i32 = arith.constant 0 : i32
    return %arg0, %arg1 : i32, i32
  }
}

</mosaic_0001>

<bundles_post_ra>
// kernel: cox_affine_forward.1
= control target key start
LH: loop header
LB: loop body
LE: loop exit
PB: predicated region body
PF: predicated region fallthrough
CT: control target
= control target key end

     0   :  { %s4555_s0 = inlined_call_operand.vmem [shape: f32[2,1024], index: 0, kind: input, shape index: {}]   ;;  %s4556_s1 = inlined_call_operand.vmem [shape: f32[512,128], index: 1, kind: input, shape index: {}]   ;;  %s4557_s2 = inlined_call_operand.<no memory space> [shape: f32[1], index: 2, kind: input, shape index: {}]   ;;  %s4558_s3 = inlined_call_operand.hbm [shape: f32[2,256], index: 3, kind: output, shape index: {}]  }
   0x1   :  { %8 = sst [smem:[#allocation2]] %s4557_s2 }
   0x2   :  { %9 = vsyncpa [#allocation4], 0 }
   0x3   :  { %11 = vsyncpa [#allocation4 + $0x1], 0  ;;  %s3083_s14 = smov 0   ;;  %s3085_s15 = smov 0  }
   0x4   :  { %s3087_s16 = smov 0   ;;  %s3089_s17 = smov 0  }
   0x5   :  { %s3091_s18 = smov 0   ;;  %s3093_s19 = smov 0  }
   0x6 LB: > { %s2105_s2 = sadd.s32 4294967295, %s3056_s19   ;;  %s2106_s20 = sadd.s32 4294967294, %s3056_s19   ;;  %s3056_s19 = sphi %s3093_s19, %s17_s19   ;;  %s3052_s18 = sphi %s3091_s18, %s4944_s18   ;;  %s3048_s17 = sphi %s3089_s17, %s4943_s17   ;;  %s3044_s16 = sphi %s3087_s16, %s4942_s16   ;;  %s3040_s15 = sphi %s3085_s15, %s4941_s15   ;;  %s3036_s14 = sphi %s3083_s14, %s4940_s14  }
   0x7   : > { %s26_s21 = sadd.s32 1, %s3052_s18  ;;  %s108_s22 = sadd.s32 1, %s3044_s16 }
   0x8   : > { %p27_p0 = scmp.ge.s32.totalorder %s26_s21, 2  ;;  %p118_p1 = scmp.ne.s32.totalorder %s3044_s16, %s3040_s15 }
   0x9   : > { %p119_p2 = scmp.eq.s32.totalorder %s2105_s2, 1  ;;  %p124_p3 = scmp.ne.s32.totalorder %s3040_s15, %s3036_s14 }
   0xa   : > { %s4946_s21 = smov (%p27_p0, %s26_s21), 0  ;;  %p125_p5 = scmp.eq.s32.totalorder %s2106_s20, 1 }
   0xb   : > { %p3123_p4 = por %p119_p2, %p118_p1  ;;  %s104_s24 = ssub.s32 %s3052_s18, %s4946_s21 }
   0xc   : > { %p2109_p6 = scmp.ge.s32.totalorder %s3056_s19, 1  ;;  %p106_p7 = scmp.eq.s32.totalorder %s104_s24, 0 }
   0xd   : > { %p3130_p8 = por %p125_p5, %p124_p3  ;;  %p162_p9 = scmp.lt.s32.totalorder %s3056_s19, 3 }
   0xe   : > { %s3136_s26 = scalar_select %p106_p7, %s3044_s16, %s108_s22  }
   0xf   : > { %p163_p10 = pnand %p2109_p6, %p162_p9 }
  0x11   : > { %166 = sbr.rel (%p163_p10) target bundleno = 489 (0x1e9), region = 32 }
  0x18   : > { %v217_v0 = vld [vmem:[%s4556_s1 + $0x80] sm:$0xff]  ;;  %v218_v1 = vld [vmem:[%s4556_s1 + $0x88] sm:$0xff]  ;;  %v219_v7 = vld [vmem:[%s4556_s1 + $0x90] sm:$0xff]  ;;  %v3058_v29 = vmov 1983009808   ;;  %s2111_s22 = sshll.u32 %s3048_s17, 2 }
  0x19   : > { %v201_v2 = vld [vmem:[%s4556_s1] sm:$0xff]  ;;  %v338_v3 = vand.u32 4294901760, %v217_v0  ;;  %v341_v4 = vand.u32 4294901760, %v218_v1  ;;  %v202_v5 = vld [vmem:[%s4556_s1 + $0x8] sm:$0xff]  ;;  %v220_v8 = vld [vmem:[%s4556_s1 + $0x98] sm:$0xff]  ;;  %v344_v10 = vand.u32 4294901760, %v219_v7  ;;  %v3191_v30 = vunpack.c.l.s4 %v3058_v29 }
  0x1a   : > { %v290_v6 = vand.u32 4294901760, %v201_v2  ;;  %v293_v9 = vand.u32 4294901760, %v202_v5  ;;  %v347_v11 = vand.u32 4294901760, %v220_v8  ;;  %v203_v12 = vld [vmem:[%s4556_s1 + $0x10] sm:$0xff]  ;;  %v204_v13 = vld [vmem:[%s4556_s1 + $0x18] sm:$0xff]  ;;  %v221_v18 = vld [vmem:[%s4556_s1 + $0xa0] sm:$0xff] }
  0x1b   : > { %v3162_v14 = vpack.c.bf16 %v341_v4, %v338_v3  ;;  %v296_v16 = vand.u32 4294901760, %v203_v12  ;;  %v299_v17 = vand.u32 4294901760, %v204_v13  ;;  %v222_v19 = vld [vmem:[%s4556_s1 + $0xa8] sm:$0xff]  ;;  %v205_v23 = vld [vmem:[%s4556_s1 + $0x20] sm:$0xff]  ;;  %v3185_v26 = vsub.f32 %v219_v7, %v344_v10  ;;  %v223_v39 = vld [vmem:[%s4556_s1 + $0xb0] sm:$0xff]  ;;  %p3370_p11 = scmp.lt.s32.totalorder %s2111_s22, 7 }
  0x1c   : > { %v3164_v15 = vsub.f32 %v201_v2, %v290_v6  ;;  %v3172_v20 = vpack.c.bf16 %v293_v9, %v290_v6  ;;  %v3174_v21 = vsub.f32 %v202_v5, %v293_v9  ;;  %v3176_v22 = vpack.c.bf16 %v347_v11, %v344_v10  ;;  %v206_v24 = vld [vmem:[%s4556_s1 + $0x28] sm:$0xff]  ;;  %v224_v44 = vld [vmem:[%s4556_s1 + $0xb8] sm:$0xff]  ;;  %v207_v57 = vld [vmem:[%s4556_s1 + $0x30] sm:$0xff]  ;;  %s265_s8 = sld [smem:[#allocation2]]  ;;  %s187_s9 = sand.u32 1, %s3040_s15  }
  0x1d   : > { %2538 = vmatprep.subr.bf16.mxu0 %v3162_v14  ;;  %v3187_v27 = vsub.f32 %v220_v8, %v347_v11  ;;  %v3189_v28 = vpack.c.bf16 %v299_v17, %v296_v16  ;;  %v350_v31 = vand.u32 4294901760, %v221_v18  ;;  %v353_v32 = vand.u32 4294901760, %v222_v19  ;;  %v208_v58 = vld [vmem:[%s4556_s1 + $0x38] sm:$0xff]  ;;  %v225_v7 = vld [vmem:[%s4556_s1 + $0xc0] sm:$0xff]  ;;  %v226_v8 = vld [vmem:[%s4556_s1 + $0xc8] sm:$0xff]  ;;  %s4948_s22 = smov (!%p3370_p11, %s2111_s22), 7 }
  0x1e   : > { %2540 = vmatpush3.bf16.msra.mxu0 %v3172_v20  ;;  %v3194_v33 = vsub.f32 %v217_v0, %v338_v3  ;;  %v3196_v34 = vsub.f32 %v218_v1, %v341_v4  ;;  %v302_v35 = vand.u32 4294901760, %v205_v23  ;;  %v305_v36 = vand.u32 4294901760, %v206_v24  ;;  %s2112_s12 = sshll.u32 %s4948_s22, 1  ;;  %s2110_s10 = sshll.u32 %s187_s9, 1 }
  0x1f   : > { %2542 = vmatprep.subr.bf16.mxu0 %v3176_v22  ;;  %v4574_v37 = vand.u32 4294901760, %v3164_v15  ;;  %v4573_v38 = vand.u32 4294901760, %v3174_v21  ;;  %v3204_v40 = vsub.f32 %v203_v12, %v296_v16  ;;  %v3206_v41 = vsub.f32 %v204_v13, %v299_v17  ;;  %v209_v13 = vld [vmem:[%s4556_s1 + $0x40] sm:$0xff]  ;;  %s198_s20 = scalar_lea.vmem %s4555_s0, %s2112_s12  ;;  %s2114_s11 = sshll.u32 %s3048_s17, 5 }
  0x20   : > { %v3208_v42 = vpack.c.bf16 %v353_v32, %v350_v31  ;;  %v4577_v43 = vand.u32 4294901760, %v3194_v33  ;;  %v3214_v45 = vsub.f32 %v221_v18, %v350_v31  ;;  %v3216_v46 = vsub.f32 %v222_v19, %v353_v32  ;;  %v210_v32 = vld [vmem:[%s4556_s1 + $0x48] sm:$0xff]  ;;  %s189_s12 = scalar_lea.vmem [#allocation3], %s2110_s10  ;;  %s4508_s22 = scalar_lea.hbm %s4558_s3, %s2114_s11 }
  0x21   : > { %v4575_v47 = vand.u32 4294901760, %v3196_v34  ;;  %v3219_v48 = vpack.c.bf16 %v305_v36, %v302_v35  ;;  %v405_v50 = vsub.f32 %v3164_v15, %v4574_v37  ;;  %v412_v51 = vsub.f32 %v3174_v21, %v4573_v38  ;;  %s2030_s13 = sshll.u32 %s189_s12, 4  ;;  %s2015_s24 = scalar_lea.sflag [#allocation4], %s187_s9  ;;  %s4510_s13 = int_to_ptr.vmem [resolvable:$true] %s2030_s13 }
  0x22   : > { %2544 = vmatpush3.bf16.msra.mxu0 %v3189_v28  ;;  %v517_v49 = vsub.f32 %v3194_v33, %v4577_v43  ;;  %v356_v52 = vand.u32 4294901760, %v223_v39  ;;  %v359_v54 = vand.u32 4294901760, %v224_v44  ;;  %v4570_v55 = vand.u32 4294901760, %v3185_v26  ;;  %s2978_s27 = scalar_lea.vmem %s4510_s13, 32  ;;  %s3059_s17 = smov [#allocation3]  }
  0x23   : > { %2546 = vmatprep.subr.bf16.mxu0 %v3208_v42  ;;  %v524_v53 = vsub.f32 %v3196_v34, %v4575_v47  ;;  %v4569_v56 = vand.u32 4294901760, %v3187_v27  ;;  %v3243_v60 = vsub.f32 %v205_v23, %v302_v35  ;;  %v406_v61 = vand.u32 4294901760, %v405_v50  ;;  %p2979_p12 = scmp.ne.s32.totalorder %s4510_s13, %s2978_s27  ;;  %s2982_s28 = sshll.u32 %s3059_s17, 4  ;;  %s2983_s28 = int_to_ptr.vmem [resolvable:$false] %s2982_s28 }
  0x24   : > { %v518_v59 = vand.u32 4294901760, %v517_v49  ;;  %v413_v62 = vand.u32 4294901760, %v412_v51  ;;  %v3245_v0 = vsub.f32 %v206_v24, %v305_v36  ;;  %v3247_v1 = vpack.c.bf16 %v359_v54, %v356_v52  ;;  %s2984_s29 = scalar_lea.vmem %s2983_s28, 64  ;;  %p2985_p1 = scmp.lt.s32.totalorder %s4510_s13, %s2983_s28 }
  0x25   : > { %v525_v63 = vand.u32 4294901760, %v524_v53  ;;  %v531_v2 = vsub.f32 %v3185_v26, %v4570_v55  ;;  %v538_v4 = vsub.f32 %v3187_v27, %v4569_v56  ;;  %v308_v5 = vand.u32 4294901760, %v207_v57  ;;  %p2980_p13 = pnand %p2979_p12, %p3123_p4  ;;  %p2986_p2 = scmp.lt.s32.totalorder %s2984_s29, %s2978_s27 }
  0x26   : > { %2548 = vmatpush3.bf16.msra.mxu0 %v3219_v48  ;;  %v2571_v3 = vpack.c.bf16 %v413_v62, %v406_v61  ;;  %v311_v6 = vand.u32 4294901760, %v208_v58  ;;  %v4568_v11 = vand.u32 4294901760, %v3204_v40  ;;  %v4567_v12 = vand.u32 4294901760, %v3206_v41  ;;  %v228_v62 = vld [vmem:[%s4556_s1 + $0xd8] sm:$0xff] }
  0x27   : > { %v2569_v9 = vpack.c.bf16 %v525_v63, %v518_v59  ;;  %2550 = vmatprep.subr.bf16.mxu0 %v3247_v1  ;;  %v532_v10 = vand.u32 4294901760, %v531_v2  ;;  %v3268_v16 = vsub.f32 %v223_v39, %v356_v52  ;;  %v3270_v17 = vsub.f32 %v224_v44, %v359_v54  ;;  %p2981_p0 = pneg %p2980_p13  ;;  %p2987_p3 = por %p2986_p2, %p2985_p1 }
  0x28   : > { %v539_v18 = vand.u32 4294901760, %v538_v4  ;;  %v3272_v19 = vpack.c.bf16 %v311_v6, %v308_v5  ;;  %v419_v23 = vsub.f32 %v3204_v40, %v4568_v11  ;;  %v426_v24 = vsub.f32 %v3206_v41, %v4567_v12  ;;  %v211_v4 = vld [vmem:[%s4556_s1 + $0x50] sm:$0xff] }
  0x29   : > { %2570 = vmatprep.subr.bf16.mxu1 %v2569_v9  ;;  %v362_v29 = vand.u32 4294901760, %v225_v7  ;;  %v365_v31 = vand.u32 4294901760, %v226_v8  ;;  %v4564_v36 = vand.u32 4294901760, %v3214_v45  ;;  %v4563_v39 = vand.u32 4294901760, %v3216_v46  ;;  %p2988_p5 = pnand %p2987_p3, %p2981_p0 }
  0x2a   : > { %2572 = vmatpush3.bf16.msra.mxu1 %v2571_v3  ;;  %v2573_v35 = vpack.c.bf16 %v539_v18, %v532_v10  ;;  %2552 = vmatpush3.bf16.msra.mxu0 %v3272_v19  ;;  %v314_v44 = vand.u32 4294901760, %v209_v13  ;;  %v3286_v49 = vsub.f32 %v207_v57, %v308_v5  ;;  %v420_v50 = vand.u32 4294901760, %v419_v23  ;;  %v227_v57 = vld [vmem:[%s4556_s1 + $0xd0] sm:$0xff] }
  0x2b   : > { %v427_v51 = vand.u32 4294901760, %v426_v24  ;;  %v3288_v52 = vpack.c.bf16 %v365_v31, %v362_v29  ;;  %v3290_v53 = vsub.f32 %v208_v58, %v311_v6  ;;  %v545_v54 = vsub.f32 %v3214_v45, %v4564_v36 }
  0x2c   : > { %2574 = vmatprep.subr.bf16.mxu1 %v2573_v35  ;;  %v552_v59 = vsub.f32 %v3216_v46, %v4563_v39  ;;  %v317_v61 = vand.u32 4294901760, %v210_v32  ;;  %v3305_v58 = vsub.f32 %v225_v7, %v362_v29  ;;  %v4560_v2 = vand.u32 4294901760, %v3243_v60 }
  0x2d   : > { %v2575_v63 = vpack.c.bf16 %v427_v51, %v420_v50  ;;  %2554 = vmatprep.subr.bf16.mxu0 %v3288_v52  ;;  %v4559_v3 = vand.u32 4294901760, %v3245_v0  ;;  %v3312_v5 = vsub.f32 %v226_v8, %v365_v31  ;;  %v546_v6 = vand.u32 4294901760, %v545_v54  ;;  %v212_v8 = vld [vmem:[%s4556_s1 + $0x58] sm:$0xff] }
  0x2e   : > { %v553_v9 = vand.u32 4294901760, %v552_v59  ;;  %v3314_v10 = vpack.c.bf16 %v317_v61, %v314_v44  ;;  %v433_v7 = vsub.f32 %v3243_v60, %v4560_v2  ;;  %v368_v23 = vand.u32 4294901760, %v227_v57 }
  0x2f   : > { %2576 = vmatpush3.bf16.msra.mxu1 %v2575_v63  ;;  %v440_v18 = vsub.f32 %v3245_v0, %v4559_v3  ;;  %v371_v24 = vand.u32 4294901760, %v228_v62  ;;  %v4562_v31 = vand.u32 4294901760, %v3268_v16  ;;  %v4561_v35 = vand.u32 4294901760, %v3270_v17 }
  0x30   : > { %v2577_v29 = vpack.c.bf16 %v553_v9, %v546_v6  ;;  %2556 = vmatpush3.bf16.msra.mxu0 %v3314_v10  ;;  %v320_v50 = vand.u32 4294901760, %v211_v4  ;;  %v3328_v51 = vsub.f32 %v209_v13, %v314_v44  ;;  %v434_v54 = vand.u32 4294901760, %v433_v7  ;;  %v229_v13 = vld [vmem:[%s4556_s1 + $0xe0] sm:$0xff]  ;;  %v230_v44 = vld [vmem:[%s4556_s1 + $0xe8] sm:$0xff] }
  0x31   : > { %v441_v59 = vand.u32 4294901760, %v440_v18  ;;  %v3330_v63 = vpack.c.bf16 %v371_v24, %v368_v23  ;;  %v3332_v3 = vsub.f32 %v210_v32, %v317_v61  ;;  %v559_v6 = vsub.f32 %v3268_v16, %v4562_v31 }
  0x32   : > { %2578 = vmatprep.subr.bf16.mxu1 %v2577_v29  ;;  %v566_v9 = vsub.f32 %v3270_v17, %v4561_v35  ;;  %v323_v2 = vand.u32 4294901760, %v212_v8  ;;  %v3348_v61 = vsub.f32 %v227_v57, %v368_v23  ;;  %v4566_v7 = vand.u32 4294901760, %v3286_v49  ;;  %v213_v29 = vld [vmem:[%s4556_s1 + $0x60] sm:$0xff] }
  0x33   : > { %v2579_v32 = vpack.c.bf16 %v441_v59, %v434_v54  ;;  %2558 = vmatprep.subr.bf16.mxu0 %v3330_v63  ;;  %v4565_v18 = vand.u32 4294901760, %v3290_v53  ;;  %v3355_v35 = vsub.f32 %v228_v62, %v371_v24  ;;  %v560_v31 = vand.u32 4294901760, %v559_v6  ;;  %v214_v62 = vld [vmem:[%s4556_s1 + $0x68] sm:$0xff] }
  0x34   : > { %v567_v39 = vand.u32 4294901760, %v566_v9  ;;  %v3357_v36 = vpack.c.bf16 %v323_v2, %v320_v50  ;;  %v447_v57 = vsub.f32 %v3286_v49, %v4566_v7  ;;  %v374_v54 = vand.u32 4294901760, %v229_v13 }
  0x35   : > { %2580 = vmatpush3.bf16.msra.mxu1 %v2579_v32  ;;  %v454_v23 = vsub.f32 %v3290_v53, %v4565_v18  ;;  %v377_v59 = vand.u32 4294901760, %v230_v44  ;;  %v4572_v6 = vand.u32 4294901760, %v3305_v58  ;;  %v4571_v9 = vand.u32 4294901760, %v3312_v5 }
  0x36   : > { %4662 = vst [vmem:[#allocation6_spill] sm:$0xff] %v3357_v36  ;;  %v2581_v24 = vpack.c.bf16 %v567_v39, %v560_v31  ;;  %2560 = vmatpush3.bf16.msra.mxu0 %v3357_v36  ;;  %v326_v32 = vand.u32 4294901760, %v213_v29  ;;  %v3377_v18 = vsub.f32 %v211_v4, %v320_v50  ;;  %v448_v7 = vand.u32 4294901760, %v447_v57  ;;  %v231_v4 = vld [vmem:[%s4556_s1 + $0xf0] sm:$0xff]  ;;  %v232_v50 = vld [vmem:[%s4556_s1 + $0xf8] sm:$0xff] }
  0x37   : > { %v455_v12 = vand.u32 4294901760, %v454_v23  ;;  %v3379_v11 = vpack.c.bf16 %v377_v59, %v374_v54  ;;  %v3381_v56 = vsub.f32 %v212_v8, %v323_v2  ;;  %v573_v39 = vsub.f32 %v3305_v58, %v4572_v6 }
  0x38   : > { %2582 = vmatprep.subr.bf16.mxu1 %v2581_v24  ;;  %v580_v31 = vsub.f32 %v3312_v5, %v4571_v9  ;;  %v329_v55 = vand.u32 4294901760, %v214_v62  ;;  %v3396_v2 = vsub.f32 %v229_v13, %v374_v54  ;;  %v4576_v8 = vand.u32 4294901760, %v3328_v51  ;;  %v215_v24 = vld [vmem:[%s4556_s1 + $0x70] sm:$0xff] }
  0x39   : > { %4664 = vst [vmem:[#allocation7_spill] sm:$0xff] %v3379_v11  ;;  %v2583_v57 = vpack.c.bf16 %v455_v12, %v448_v7  ;;  %2562 = vmatprep.subr.bf16.mxu0 %v3379_v11  ;;  %v4578_v23 = vand.u32 4294901760, %v3332_v3  ;;  %v3409_v9 = vsub.f32 %v230_v44, %v377_v59  ;;  %v574_v6 = vand.u32 4294901760, %v573_v39  ;;  %v216_v44 = vld [vmem:[%s4556_s1 + $0x78] sm:$0xff] }
  0x3a   : > { %v581_v12 = vand.u32 4294901760, %v580_v31  ;;  %v3411_v7 = vpack.c.bf16 %v329_v55, %v326_v32  ;;  %v461_v13 = vsub.f32 %v3328_v51, %v4576_v8  ;;  %v380_v38 = vand.u32 4294901760, %v231_v4 }
  0x3b   : > { %2584 = vmatpush3.bf16.msra.mxu1 %v2583_v57  ;;  %v468_v54 = vsub.f32 %v3332_v3, %v4578_v23  ;;  %v383_v37 = vand.u32 4294901760, %v232_v50  ;;  %v4587_v39 = vand.u32 4294901760, %v3348_v61  ;;  %v4583_v31 = vand.u32 4294901760, %v3355_v35 }
  0x3c   : > { %4665 = vst [vmem:[#allocation8_spill] sm:$0xff] %v3411_v7  ;;  %v2585_v59 = vpack.c.bf16 %v581_v12, %v574_v6  ;;  %2564 = vmatpush3.bf16.msra.mxu0 %v3411_v7  ;;  %v332_v57 = vand.u32 4294901760, %v215_v24  ;;  %v3425_v47 = vsub.f32 %v213_v29, %v326_v32  ;;  %v462_v8 = vand.u32 4294901760, %v461_v13 }
  0x3d   : > { %v469_v43 = vand.u32 4294901760, %v468_v54  ;;  %v3427_v25 = vpack.c.bf16 %v383_v37, %v380_v38  ;;  %v3430_v23 = vsub.f32 %v214_v62, %v329_v55  ;;  %v587_v6 = vsub.f32 %v3348_v61, %v4587_v39 }
  0x3e   : > { %2586 = vmatprep.subr.bf16.mxu1 %v2585_v59  ;;  %v594_v12 = vsub.f32 %v3355_v35, %v4583_v31  ;;  %v335_v7 = vand.u32 4294901760, %v216_v44  ;;  %v3439_v29 = vsub.f32 %v231_v4, %v380_v38  ;;  %v4584_v32 = vand.u32 4294901760, %v3377_v18  ;;  %v3463_v31 = vld [vmem:[%s198_s20] sm:$0xff] }
  0x3f   : > { %4666 = vst [vmem:[#allocation9_spill] sm:$0xff] %v3427_v25  ;;  %v2587_v11 = vpack.c.bf16 %v469_v43, %v462_v8  ;;  %2566 = vmatprep.subr.bf16.mxu0 %v3427_v25  ;;  %v4585_v13 = vand.u32 4294901760, %v3381_v56  ;;  %v3443_v55 = vsub.f32 %v232_v50, %v383_v37  ;;  %v588_v62 = vand.u32 4294901760, %v587_v6  ;;  %4671 = vst [vmem:[#allocation13_spill] sm:$0xff] %v3463_v31 }
  0x40   : > { %4667 = vst [vmem:[#allocation10_spill] sm:$0xff] %v3439_v29  ;;  %v595_v54 = vand.u32 4294901760, %v594_v12  ;;  %v3445_v59 = vpack.c.bf16 %v335_v7, %v332_v57  ;;  %v3450_v43 = vsub.f32 %v215_v24, %v332_v57  ;;  %v475_v38 = vsub.f32 %v3377_v18, %v4584_v32 }
  0x41   : > { %4668 = vst [vmem:[#allocation11_spill] sm:$0xff] %v3443_v55  ;;  %2588 = vmatpush3.bf16.msra.mxu1 %v2587_v11  ;;  %v482_v37 = vsub.f32 %v3381_v56, %v4585_v13  ;;  %v271_v4 = vunpack.c.0.s8 %v3191_v30  ;;  %v4670_v8 = vlaneseq  ;;  %v4586_v12 = vand.u32 4294901760, %v3396_v2 }
  0x42   : > { %4669 = vst [vmem:[#allocation12_spill] sm:$0xff] %v3445_v59  ;;  %v2589_v50 = vpack.c.bf16 %v595_v54, %v588_v62  ;;  %2568 = vmatpush3.bf16.msra.mxu0 %v3445_v59  ;;  %v4588_v11 = vand.u32 4294901760, %v3409_v9  ;;  %v476_v24 = vand.u32 4294901760, %v475_v38  ;;  %v2601_v32 = vpack.c.bf16 %v3196_v34, %v3194_v33 }
  0x43   : > { %v273_v6 = vshrl.u32 %v4670_v8, 7  ;;  %v483_v57 = vand.u32 4294901760, %v482_v37  ;;  %v4589_v13 = vand.u32 4294901760, %v3425_v47  ;;  %v601_v62 = vsub.f32 %v3396_v2, %v4586_v12 }
  0x44   : > { %2590 = vmatprep.subr.bf16.mxu1 %v2589_v50  ;;  %v608_v54 = vsub.f32 %v3409_v9, %v4588_v11  ;;  %v4597_v38 = vand.u32 4294901760, %v3430_v23  ;;  %v3477_v37 = vsub.f32 %v216_v44, %v335_v7  ;;  %2602 = vmatprep.subr.bf16.mxu0 %v2601_v32  ;;  %v621_v32 = vand.u32 4294901760, %v3443_v55 }
  0x45   : > { %v3468_v30 = vsub.s32 %v271_v4, %v273_v6  ;;  %v2591_v8 = vpack.c.bf16 %v483_v57, %v476_v24  ;;  %v489_v50 = vsub.f32 %v3425_v47, %v4589_v13  ;;  %v614_v4 = vand.u32 4294901760, %v3439_v29 }
  0x46   : > { %v602_v12 = vand.u32 4294901760, %v601_v62  ;;  %v609_v39 = vand.u32 4294901760, %v608_v54  ;;  %v496_v11 = vsub.f32 %v3430_v23, %v4597_v38  ;;  %v502_v62 = vand.u32 4294901760, %v3450_v43 }
  0x47   : > { %4672 = vst [vmem:[#allocation14_spill] sm:$0xff] %v3468_v30  ;;  %v275_v6 = vrot.slane %v3463_v31, %v3468_v30  ;;  %2592 = vmatpush3.bf16.msra.mxu1 %v2591_v8  ;;  %v490_v7 = vand.u32 4294901760, %v489_v50  ;;  %v615_v44 = vsub.f32 %v3439_v29, %v614_v4  ;;  %v622_v30 = vsub.f32 %v3443_v55, %v621_v32 }
  0x48   : > { %v2593_v13 = vpack.c.bf16 %v609_v39, %v602_v12  ;;  %v497_v59 = vand.u32 4294901760, %v496_v11  ;;  %v509_v54 = vand.u32 4294901760, %v3477_v37  ;;  %v503_v29 = vsub.f32 %v3450_v43, %v502_v62 }
  0x49   : > { %v283_v24 = vcombine.high %v275_v6, %v275_v6  ;;  %v3490_v57 = vand.u32 4294901760, %v275_v6  ;;  %v616_v25 = vand.u32 4294901760, %v615_v44  ;;  %v623_v38 = vand.u32 4294901760, %v622_v30 }
  0x4a   : > { %2594 = vmatprep.subr.bf16.mxu1 %v2593_v13  ;;  %v2595_v50 = vpack.c.bf16 %v497_v59, %v490_v7  ;;  %v510_v39 = vsub.f32 %v3477_v37, %v509_v54  ;;  %v504_v55 = vand.u32 4294901760, %v503_v29  ;;  %v2603_v7 = vpack.c.bf16 %v3174_v21, %v3164_v15 }
  0x4b   : > { %4673 = vst [vmem:[#allocation15_spill] sm:$0xff] %v3490_v57  ;;  %v3495_v31 = vand.u32 4294901760, %v283_v24  ;;  %v3498_v8 = vsub.f32 %v275_v6, %v3490_v57  ;;  %v2597_v44 = vpack.c.bf16 %v623_v38, %v616_v25  ;;  %v4675_v25 = vand.u32 4294901760, %v3194_v33 }
  0x4c   : > { %2596 = vmatpush3.bf16.msra.mxu1 %v2595_v50  ;;  %v511_v36 = vand.u32 4294901760, %v510_v39  ;;  %v4676_v29 = vand.u32 4294901760, %v3196_v34  ;;  %v4677_v39 = vand.u32 4294901760, %v3164_v15  ;;  %v4681_v33 = vand.u32 4294901760, %v3204_v40 }
  0x4d   : > { %4674 = vst [vmem:[#allocation16_spill] sm:$0xff] %v3495_v31  ;;  %v386_v12 = vsub.f32 %v283_v24, %v3495_v31  ;;  %v4602_v11 = vand.u32 4294901760, %v3498_v8  ;;  %626 = vmatprep.mubr.f32.mxu1 %v3495_v31  ;;  %2598 = vmatprep.subr.bf16.mxu1 %v2597_v44  ;;  %v2605_v24 = vpack.c.bf16 %v3187_v27, %v3185_v26  ;;  %v4678_v44 = vand.u32 4294901760, %v3174_v21 }
  0x4e   : > { %v2599_v30 = vpack.c.bf16 %v511_v36, %v504_v55  ;;  %v3516_v38 = vpack.c.bf16 %v4676_v29, %v4675_v25  ;;  %v4679_v55 = vand.u32 4294901760, %v3185_v26  ;;  %v4682_v34 = vand.u32 4294901760, %v3206_v41 }
  0x4f   : > { %v387_v13 = vand.u32 4294901760, %v386_v12  ;;  %v394_v59 = vsub.f32 %v3498_v8, %v4602_v11  ;;  %v3522_v36 = vpack.c.bf16 %v4678_v44, %v4677_v39  ;;  %v4680_v11 = vand.u32 4294901760, %v3187_v27 }
  0x50   : > { %2600 = vmatpush3.bf16.msra.mxu1 %v2599_v30  ;;  %v3535_v30 = vpack.c.bf16 %v4682_v34, %v4681_v33  ;;  %v4683_v15 = vand.u32 4294901760, %v3214_v45  ;;  %v4684_v21 = vand.u32 4294901760, %v3216_v46  ;;  %v4685_v26 = vand.u32 4294901760, %v3243_v60 }
  0x51   : > { %v388_v6 = vsub.f32 %v386_v12, %v387_v13  ;;  %v395_v50 = vand.u32 4294901760, %v394_v59  ;;  %v3528_v31 = vpack.c.bf16 %v4680_v11, %v4679_v55  ;;  %2634 = vmatprep.subr.bf16.mxu1 %v3162_v14  ;;  %v4686_v27 = vand.u32 4294901760, %v3245_v0 }
  0x52   : > { %v3541_v25 = vpack.c.bf16 %v4684_v21, %v4683_v15  ;;  %v4689_v29 = vand.u32 4294901760, %v3270_v17  ;;  %v4690_v44 = vand.u32 4294901760, %v3286_v49  ;;  %v4691_v55 = vand.u32 4294901760, %v3290_v53 }
  0x53   : > { %v389_v59 = vand.u32 4294901760, %v388_v6  ;;  %v3547_v11 = vpack.c.bf16 %v4686_v27, %v4685_v26  ;;  %v4688_v6 = vand.u32 4294901760, %v3268_v16  ;;  %v4692_v34 = vand.u32 4294901760, %v3305_v58  ;;  %628 = vmatmul.mubr.f32.vlgmr.msra.gmra.mrb[0].mxu1 %v3490_v57 }
  0x54   : > { %v3559_v33 = vpack.c.bf16 %v4691_v55, %v4690_v44  ;;  %v4693_v15 = vand.u32 4294901760, %v3312_v5  ;;  %v4695_v26 = vand.u32 4294901760, %v3328_v51  ;;  %v4696_v27 = vand.u32 4294901760, %v3332_v3  ;;  %2636 = vmatpush3.bf16.msra.mxu1 %v3172_v20  ;;  %870 = vmatprep.mubr.f32.mxu1 %v387_v13  ;;  %v3672_v13 = vld [vmem:[%s4556_s1 + $0x198] sm:$0xff] }
  0x55   : > { %4687 = vst [vmem:[#allocation17_spill] sm:$0xff] %v3547_v11  ;;  %v3553_v39 = vpack.c.bf16 %v4689_v29, %v4688_v6  ;;  %390 = vmatprep.mubr.f32.mxu0 %v389_v59  ;;  %v4697_v6 = vand.u32 4294901760, %v3348_v61  ;;  %v4698_v29 = vand.u32 4294901760, %v3355_v35  ;;  %v4700_v55 = vand.u32 4294901760, %v3377_v18  ;;  %2638 = vmatprep.subr.bf16.mxu1 %v3176_v22 }
  0x56   : > { %v3565_v21 = vpack.c.bf16 %v4693_v15, %v4692_v34  ;;  %v3571_v11 = vpack.c.bf16 %v4696_v27, %v4695_v26  ;;  %v4701_v34 = vand.u32 4294901760, %v3381_v56  ;;  %v4703_v26 = vand.u32 4294901760, %v3409_v9  ;;  %396 = vmatmul.mubr.f32.vlgmr.msra.gmra.mrb[0].mxu0 %v395_v50 }
  0x57   : > { %v3578_v44 = vpack.c.bf16 %v4698_v29, %v4697_v6  ;;  %v4704_v59 = vand.u32 4294901760, %v3425_v47  ;;  %v4705_v6 = vand.u32 4294901760, %v3430_v23  ;;  %v3599_v57 = vpack.c.bf16 %v621_v32, %v614_v4  ;;  %2604 = vmatpush3.bf16.msra.mxu0 %v2603_v7  ;;  %763 = vmatprep.mubr.f32.mxu0 %v386_v12 }
  0x58   : > { %4694 = vst [vmem:[#allocation18_spill] sm:$0xff] %v3565_v21  ;;  %v3584_v15 = vpack.c.bf16 %v4701_v34, %v4700_v55  ;;  %v4702_v21 = vand.u32 4294901760, %v3396_v2  ;;  %v2607_v55 = vpack.c.bf16 %v3206_v41, %v3204_v40  ;;  %2606 = vmatprep.subr.bf16.mxu0 %v2605_v24  ;;  %v2609_v50 = vpack.c.bf16 %v3216_v46, %v3214_v45 }
  0x59   : > { %4699 = vst [vmem:[#allocation19_spill] sm:$0xff] %v3578_v44  ;;  %v3597_v29 = vpack.c.bf16 %v4705_v6, %v4704_v59  ;;  %v3601_v44 = vpack.c.bf16 %v509_v54, %v502_v62  ;;  %2640 = vmatpush3.bf16.msra.mxu1 %v3189_v28  ;;  %v2611_v4 = vpack.c.bf16 %v3245_v0, %v3243_v60  ;;  %v3627_v60 = vld [vmem:[%s4556_s1 + $0x180] sm:$0xff]  ;;  %v250_v0 = vld [vmem:[%s4556_s1 + $0x188] sm:$0xff]  ;;  %v4607_v6 = vand.u32 4294901760, %v3672_v13 }
  0x5a   : > { %v3590_v27 = vpack.c.bf16 %v4703_v26, %v4702_v21  ;;  %2642 = vmatprep.subr.bf16.mxu1 %v3208_v42  ;;  %v2613_v40 = vpack.c.bf16 %v3270_v17, %v3268_v16  ;;  %v2615_v41 = vpack.c.bf16 %v3290_v53, %v3286_v49  ;;  %v2617_v45 = vpack.c.bf16 %v3312_v5, %v3305_v58  ;;  %v3639_v53 = vld [vmem:[%s4556_s1 + $0x100] sm:$0xff]  ;;  %v3644_v58 = vld [vmem:[%s4556_s1 + $0x108] sm:$0xff] }
  0x5b   : > { %2608 = vmatpush3.bf16.msra.mxu0 %v2607_v55  ;;  %v2619_v46 = vpack.c.bf16 %v3332_v3, %v3328_v51  ;;  %v2621_v16 = vpack.c.bf16 %v3355_v35, %v3348_v61  ;;  %v1200_v17 = vand.u32 4294901760, %v3627_v60  ;;  %v1203_v49 = vand.u32 4294901760, %v250_v0  ;;  %v4706_v61 = vld [vmem:[#allocation6_spill] sm:$0xff]  ;;  %v4710_v54 = vld [vmem:[#allocation11_spill] sm:$0xff]  ;;  %v4713_v59 = vld [vmem:[#allocation9_spill] sm:$0xff] }
  0x5c   : > { %2610 = vmatprep.subr.bf16.mxu0 %v2609_v50  ;;  %v2623_v3 = vpack.c.bf16 %v3381_v56, %v3377_v18  ;;  %v2625_v5 = vpack.c.bf16 %v3409_v9, %v3396_v2  ;;  %v1152_v35 = vand.u32 4294901760, %v3639_v53  ;;  %v1155_v51 = vand.u32 4294901760, %v3644_v58  ;;  %v3662_v56 = vld [vmem:[%s4556_s1 + $0x190] sm:$0xff]  ;;  %v4709_v2 = vld [vmem:[#allocation10_spill] sm:$0xff]  ;;  %v3696_v50 = vld [vmem:[%s4556_s1 + $0x118] sm:$0xff] }
  0x5d   : > { %2644 = vmatpush3.bf16.msra.mxu1 %v3219_v48  ;;  %v3655_v32 = vsub.f32 %v3627_v60, %v1200_v17  ;;  %v3657_v62 = vsub.f32 %v250_v0, %v1203_v49  ;;  %4707 = vst [vmem:[#allocation6_spill] sm:$0xff] %v3662_v56  ;;  %v2627_v18 = vpack.c.bf16 %v3430_v23, %v3425_v47  ;;  %v4708_v9 = vld [vmem:[#allocation7_spill] sm:$0xff]  ;;  %v4608_v21 = vand.u32 4294901760, %v3662_v56  ;;  %v4712_v47 = vld [vmem:[#allocation8_spill] sm:$0xff] }
  0x5e   : > { %2646 = vmatprep.subr.bf16.mxu1 %v3247_v1  ;;  %v2629_v12 = vpack.c.bf16 %v4710_v54, %v4709_v2  ;;  %4711 = vst [vmem:[#allocation7_spill] sm:$0xff] %v3672_v13  ;;  %v3675_v7 = vsub.f32 %v3639_v53, %v1152_v35  ;;  %v3678_v24 = vsub.f32 %v3644_v58, %v1155_v51  ;;  %v3691_v55 = vld [vmem:[%s4556_s1 + $0x110] sm:$0xff]  ;;  %4715 = vst [vmem:[#allocation11_spill] sm:$0xff] %v3696_v50  ;;  %v4722_v2 = vld [vmem:[#allocation13_spill] sm:$0xff] }
  0x5f   : > { %2612 = vmatpush3.bf16.msra.mxu0 %v2611_v4  ;;  %v4610_v23 = vand.u32 4294901760, %v3655_v32  ;;  %v4609_v34 = vand.u32 4294901760, %v3657_v62  ;;  %v2631_v26 = vpack.c.bf16 %v3477_v37, %v3450_v43  ;;  %4714 = vst [vmem:[#allocation10_spill] sm:$0xff] %v3691_v55  ;;  %v3701_v4 = vld [vmem:[%s4556_s1 + $0x1a0] sm:$0xff]  ;;  %v3706_v43 = vsub.f32 %v3662_v56, %v4608_v21  ;;  %v3711_v37 = vld [vmem:[%s4556_s1 + $0x1a8] sm:$0xff]  ;;  %v4720_v60 = vld [vmem:[#allocation12_spill] sm:$0xff] }
  0x60   : > { %2614 = vmatprep.subr.bf16.mxu0 %v2613_v40  ;;  %4716 = vst [vmem:[#allocation8_spill] sm:$0xff] %v3701_v4  ;;  %4717 = vst [vmem:[#allocation9_spill] sm:$0xff] %v3711_v37  ;;  %v3716_v40 = vld [vmem:[%s4556_s1 + $0x120] sm:$0xff]  ;;  %v4617_v0 = vand.u32 4294901760, %v3691_v55  ;;  %v3737_v58 = vsub.f32 %v3672_v13, %v4607_v6  ;;  %v4723_v6 = vand.u32 4294901760, %v3498_v8  ;;  %v3754_v21 = vpack.c.bf16 %v1203_v49, %v1200_v17 }
  0x61   : > { %2648 = vmatpush3.bf16.msra.mxu1 %v3272_v19  ;;  %4718 = vst [vmem:[#allocation20_spill] sm:$0xff] %v3716_v40  ;;  %v1386_v53 = vsub.f32 %v3657_v62, %v4609_v34  ;;  %v4619_v54 = vand.u32 4294901760, %v3706_v43 }
  0x62   : > { %2650 = vmatprep.subr.bf16.mxu1 %v3288_v52  ;;  %v3773_v17 = vsub.f32 %v3691_v55, %v4617_v0 }
  0x63   : > { %2616 = vmatpush3.bf16.msra.mxu0 %v2615_v41  ;;  %v3721_v41 = vld [vmem:[%s4556_s1 + $0x128] sm:$0xff] }
  0x64   : > { %2618 = vmatprep.subr.bf16.mxu0 %v2617_v45  ;;  %4719 = vst [vmem:[#allocation21_spill] sm:$0xff] %v3721_v41  ;;  %v4612_v45 = vand.u32 4294901760, %v3675_v7 }
  0x65   : > { %2652 = vmatpush3.bf16.msra.mxu1 %v3314_v10 }
  0x66   : > { %2654 = vmatprep.subr.bf16.mxu1 %v3330_v63  ;;  %v1267_v34 = vsub.f32 %v3675_v7, %v4612_v45  ;;  %v3779_v45 = vld [vmem:[%s4556_s1 + $0x130] sm:$0xff] }
  0x67   : > { %2620 = vmatpush3.bf16.msra.mxu0 %v2619_v46  ;;  %v4611_v46 = vand.u32 4294901760, %v3678_v24  ;;  %4725 = vst [vmem:[#allocation22_spill] sm:$0xff] %v3779_v45 }
  0x68   : > { %2622 = vmatprep.subr.bf16.mxu0 %v2621_v16  ;;  %v1379_v16 = vsub.f32 %v3655_v32, %v4610_v23 }
  0x69   : > { %2656 = vmatpush3.bf16.msra.mxu1 %v4706_v61  ;;  %v1274_v23 = vsub.f32 %v3678_v24, %v4611_v46 }
  0x6a   : > { %2658 = vmatprep.subr.bf16.mxu1 %v4708_v9  ;;  %v1380_v49 = vand.u32 4294901760, %v1379_v16 }
  0x6b   : > { %2624 = vmatpush3.bf16.msra.mxu0 %v2623_v3  ;;  %v4614_v3 = vand.u32 4294901760, %v3696_v50  ;;  %v1275_v0 = vand.u32 4294901760, %v1274_v23 }
  0x6c   : > { %2626 = vmatprep.subr.bf16.mxu0 %v2625_v5  ;;  %v4613_v5 = vand.u32 4294901760, %v3701_v4 }
  0x6d   : > { %2660 = vmatpush3.bf16.msra.mxu1 %v4712_v47 }
  0x6e   : > { %2662 = vmatprep.subr.bf16.mxu1 %v4713_v59  ;;  %v3793_v16 = vsub.f32 %v3701_v4, %v4613_v5 }
  0x6f   : > { %2628 = vmatpush3.bf16.msra.mxu0 %v2627_v18  ;;  %v3744_v18 = vld [vmem:[%s4556_s1 + $0x1b0] sm:$0xff] }
  0x70   : > { %2630 = vmatprep.subr.bf16.mxu0 %v2629_v12  ;;  %4721 = vst [vmem:[#allocation12_spill] sm:$0xff] %v3744_v18  ;;  %v4616_v12 = vand.u32 4294901760, %v3716_v40 }
  0x71   : > { %2664 = vmatpush3.bf16.msra.mxu1 %v4720_v60 }
  0x72   : > { %2698 = vmatprep.subr.bf16.mxu1 %v3162_v14  ;;  %v4615_v14 = vand.u32 4294901760, %v3711_v37 }
  0x73   : > { %2632 = vmatpush3.bf16.msra.mxu0 %v2631_v26  ;;  %v4618_v26 = vand.u32 4294901760, %v3721_v41 }
  0x74   : > { %2666 = vmatprep.subr.bf16.mxu0 %v3516_v38  ;;  %874 = vmatmul.mubr.f32.vlgmr.msra.gmra.mrb[2].mxu1 %v4723_v6  ;;  %v3765_v38 = vld [vmem:[%s4556_s1 + $0x1b8] sm:$0xff]  ;;  %v1387_v6 = vand.u32 4294901760, %v1386_v53  ;;  %v3839_v53 = vld [vmem:[%s4556_s1 + $0x140] sm:$0xff] }
  0x75   : > { %4724 = vst [vmem:[#allocation13_spill] sm:$0xff] %v3765_v38  ;;  %2700 = vmatpush3.bf16.msra.mxu1 %v3172_v20  ;;  %v3788_v20 = vsub.f32 %v3696_v50, %v4614_v3  ;;  %v3816_v5 = vsub.f32 %v3721_v41, %v4618_v26  ;;  %v3833_v26 = vsub.f32 %v3706_v43, %v4619_v54  ;;  %4731 = vst [vmem:[#allocation26_spill] sm:$0xff] %v3839_v53  ;;  %v3854_v3 = vld [vmem:[%s4556_s1 + $0x148] sm:$0xff] }
  0x76   : > { %766 = vmatmul.mubr.f32.vlgmr.msra.gmra.mrb[2].mxu0 %v3498_v8  ;;  %2702 = vmatprep.subr.bf16.mxu1 %v3176_v22  ;;  %v3783_v8 = vpack.c.bf16 %v1155_v51, %v1152_v35  ;;  %v4728_v22 = vld [vmem:[#allocation16_spill] sm:$0xff]  ;;  %v3806_v35 = vsub.f32 %v3711_v37, %v4615_v14  ;;  %v3811_v51 = vsub.f32 %v3716_v40, %v4616_v12  ;;  %v3827_v14 = vld [vmem:[%s4556_s1 + $0x1c8] sm:$0xff]  ;;  %v1268_v12 = vand.u32 4294901760, %v1267_v34 }
  0x77   : > { %2668 = vmatpush3.bf16.msra.mxu0 %v3522_v36  ;;  %v3799_v36 = vld [vmem:[%s4556_s1 + $0x138] sm:$0xff]  ;;  %1040 = vmatprep.mubr.f32.mxu0 %v4728_v22  ;;  %4730 = vst [vmem:[#allocation25_spill] sm:$0xff] %v3827_v14  ;;  %v3842_v46 = vpack.c.bf16 %v1387_v6, %v1380_v49  ;;  %4733 = vst [vmem:[#allocation27_spill] sm:$0xff] %v3854_v3  ;;  %v4735_v34 = vand.u32 4294901760, %v3765_v38  ;;  %v4743_v6 = vld [vmem:[#allocation14_spill] sm:$0xff] }
  0x78   : > { %4726 = vst [vmem:[#allocation23_spill] sm:$0xff] %v3783_v8  ;;  %4727 = vst [vmem:[#allocation24_spill] sm:$0xff] %v3799_v36  ;;  %2670 = vmatprep.subr.bf16.mxu0 %v3528_v31  ;;  %v3822_v31 = vld [vmem:[%s4556_s1 + $0x1c0] sm:$0xff]  ;;  %1144 = vmatprep.mubr.f32.mxu1 %v4728_v22  ;;  %v4732_v22 = vand.u32 4294901760, %v3744_v18  ;;  %v3875_v41 = vpack.c.bf16 %v1275_v0, %v1268_v12  ;;  %v4754_v12 = vand.u32 4294901760, %v3839_v53  ;;  %v3984_v8 = vld [vmem:[%s4556_s1 + $0x168] sm:$0xff] }
  0x79   : > { %4729 = vst [vmem:[#allocation16_spill] sm:$0xff] %v3822_v31  ;;  %2704 = vmatpush3.bf16.msra.mxu1 %v3189_v28  ;;  %v4734_v28 = vand.u32 4294901760, %v3737_v58  ;;  %v4763_v40 = vand.u32 4294901760, %v3811_v51 }
  0x7a   : > { %v3847_v23 = vsub.f32 %v3744_v18, %v4732_v22  ;;  %2706 = vmatprep.subr.bf16.mxu1 %v3208_v42  ;;  %v3870_v18 = vsub.f32 %v3765_v38, %v4735_v34  ;;  %4737 = vst [vmem:[#allocation29_spill] sm:$0xff] %v3875_v41  ;;  %v4738_v22 = vand.u32 4294901760, %v3779_v45  ;;  %v4740_v34 = vand.u32 4294901760, %v3799_v36  ;;  %v4007_v41 = vld [vmem:[%s4556_s1 + $0x170] sm:$0xff] }
  0x7b   : > { %2672 = vmatpush3.bf16.msra.mxu0 %v3535_v30  ;;  %v3861_v49 = vsub.f32 %v3737_v58, %v4734_v28  ;;  %v4741_v28 = vand.u32 4294901760, %v3773_v17  ;;  %v4747_v30 = vand.u32 4294901760, %v3788_v20  ;;  %v4000_v4 = vsub.f32 %v3811_v51, %v4763_v40 }
  0x7c   : > { %2674 = vmatprep.subr.bf16.mxu0 %v3541_v25  ;;  %4736 = vst [vmem:[#allocation28_spill] sm:$0xff] %v3870_v18  ;;  %v3881_v54 = vsub.f32 %v3779_v45, %v4738_v22  ;;  %v3888_v42 = vsub.f32 %v3799_v36, %v4740_v34  ;;  %v3899_v22 = vld [vmem:[%s4556_s1 + $0x1d0] sm:$0xff]  ;;  %v4744_v34 = vcombine.high %v4722_v2, %v4722_v2  ;;  %v4748_v45 = vand.u32 4294901760, %v3822_v31 }
  0x7d   : > { %2708 = vmatpush3.bf16.msra.mxu1 %v3219_v48  ;;  %v3893_v0 = vsub.f32 %v3773_v17, %v4741_v28  ;;  %v3904_v48 = vld [vmem:[%s4556_s1 + $0x1d8] sm:$0xff]  ;;  %v3918_v36 = vsub.f32 %v3788_v20, %v4747_v30  ;;  %v4749_v2 = vand.u32 4294901760, %v3827_v14  ;;  %4764 = vst [vmem:[#allocation40_spill] sm:$0xff] %v4000_v4  ;;  %v4767_v40 = vand.u32 4294901760, %v3899_v22 }
  0x7e   : > { %4739 = vst [vmem:[#allocation30_spill] sm:$0xff] %v3881_v54  ;;  %4742 = vst [vmem:[#allocation31_spill] sm:$0xff] %v3904_v48  ;;  %v3910_v25 = vrot.slane %v4744_v34, %v4743_v6  ;;  %v4746_v28 = vld [vmem:[#allocation17_spill] sm:$0xff]  ;;  %2710 = vmatprep.subr.bf16.mxu1 %v3247_v1  ;;  %v3923_v38 = vsub.f32 %v3822_v31, %v4748_v45  ;;  %v3933_v1 = vld [vmem:[%s4556_s1 + $0x150] sm:$0xff]  ;;  %v4752_v45 = vand.u32 4294901760, %v3793_v16 }
  0x7f   : > { %2676 = vmatpush3.bf16.msra.mxu0 %v4746_v28  ;;  %v3928_v6 = vsub.f32 %v3827_v14, %v4749_v2  ;;  %v3938_v30 = vld [vmem:[%s4556_s1 + $0x158] sm:$0xff]  ;;  %v4753_v28 = vand.u32 4294901760, %v3806_v35  ;;  %v3954_v14 = vsub.f32 %v3839_v53, %v4754_v12  ;;  %v3959_v31 = vld [vmem:[%s4556_s1 + $0x1e0] sm:$0xff]  ;;  %v4759_v12 = vand.u32 4294901760, %v3854_v3 }
  0x80   : > { %4745 = vst [vmem:[#allocation14_spill] sm:$0xff] %v3910_v25  ;;  %4751 = vst [vmem:[#allocation32_spill] sm:$0xff] %v3938_v30  ;;  %2678 = vmatprep.subr.bf16.mxu0 %v3553_v39  ;;  %v3944_v34 = vsub.f32 %v3793_v16, %v4752_v45  ;;  %v3964_v39 = vld [vmem:[%s4556_s1 + $0x1e8] sm:$0xff]  ;;  %v3969_v45 = vld [vmem:[%s4556_s1 + $0x160] sm:$0xff] }
  0x81   : > { %4750 = vst [vmem:[#allocation17_spill] sm:$0xff] %v3928_v6  ;;  %v3949_v2 = vsub.f32 %v3806_v35, %v4753_v28  ;;  %4755 = vst [vmem:[#allocation33_spill] sm:$0xff] %v3954_v14  ;;  %v284_v28 = vcombine.high %v3910_v25, %v3910_v25  ;;  %v3976_v53 = vsub.f32 %v3854_v3, %v4759_v12  ;;  %v3989_v25 = vld [vmem:[%s4556_s1 + $0x1f0] sm:$0xff]  ;;  %v3994_v12 = vld [vmem:[%s4556_s1 + $0x1f8] sm:$0xff]  ;;  %2712 = vmatpush3.bf16.msra.mxu1 %v3272_v19 }
  0x82   : > { %4756 = vst [vmem:[#allocation34_spill] sm:$0xff] %v3959_v31  ;;  %4757 = vst [vmem:[#allocation35_spill] sm:$0xff] %v3964_v39  ;;  %2714 = vmatprep.subr.bf16.mxu1 %v3288_v52  ;;  %v4766_v3 = vld [vmem:[#allocation18_spill] sm:$0xff]  ;;  %v4025_v52 = vld [vmem:[%s4556_s1 + $0x178] sm:$0xff]  ;;  %v4030_v19 = vsub.f32 %v3899_v22, %v4767_v40  ;;  %v4773_v40 = vand.u32 4294901760, %v3938_v30 }
  0x83   : > { %4758 = vst [vmem:[#allocation36_spill] sm:$0xff] %v3969_v45  ;;  %4760 = vst [vmem:[#allocation37_spill] sm:$0xff] %v3976_v53  ;;  %v4009_v50 = vand.u32 4294901760, %v284_v28  ;;  %2680 = vmatpush3.bf16.msra.mxu0 %v3559_v33  ;;  %v4772_v33 = vand.u32 4294901760, %v3933_v1 }
  0x84   : > { %4761 = vst [vmem:[#allocation38_spill] sm:$0xff] %v3989_v25  ;;  %4762 = vst [vmem:[#allocation39_spill] sm:$0xff] %v3994_v12  ;;  %2682 = vmatprep.subr.bf16.mxu0 %v4766_v3  ;;  %v4769_v3 = vand.u32 4294901760, %v3904_v48  ;;  %v4050_v55 = vsub.f32 %v3938_v30, %v4773_v40  ;;  %v4776_v30 = vld [vmem:[#allocation19_spill] sm:$0xff]  ;;  %v4780_v40 = vand.u32 4294901760, %v3994_v12 }
  0x85   : > { %4765 = vst [vmem:[#allocation41_spill] sm:$0xff] %v4009_v50  ;;  %4768 = vst [vmem:[#allocation18_spill] sm:$0xff] %v4030_v19  ;;  %v4039_v56 = vsub.f32 %v284_v28, %v4009_v50  ;;  %2716 = vmatpush3.bf16.msra.mxu1 %v3314_v10  ;;  %v4045_v37 = vsub.f32 %v3933_v1, %v4772_v33  ;;  %v4774_v10 = vand.u32 4294901760, %v3959_v31  ;;  %v4775_v33 = vand.u32 4294901760, %v3964_v39 }
  0x86   : > { %v4035_v4 = vsub.f32 %v3904_v48, %v4769_v3  ;;  %2718 = vmatprep.subr.bf16.mxu1 %v3330_v63  ;;  %v4778_v48 = vand.u32 4294901760, %v3984_v8  ;;  %v4087_v3 = vsub.f32 %v3994_v12, %v4780_v40  ;;  %v4789_v12 = vand.u32 4294901760, %v3678_v24 }
  0x87   : > { %4771 = vst [vmem:[#allocation43_spill] sm:$0xff] %v4039_v56  ;;  %2684 = vmatpush3.bf16.msra.mxu0 %v3571_v11  ;;  %v4059_v28 = vsub.f32 %v3959_v31, %v4774_v10  ;;  %v4064_v13 = vsub.f32 %v3964_v39, %v4775_v33  ;;  %v4777_v11 = vand.u32 4294901760, %v3969_v45  ;;  %v4779_v31 = vand.u32 4294901760, %v3989_v25 }
  0x88   : > { %4770 = vst [vmem:[#allocation42_spill] sm:$0xff] %v4035_v4  ;;  %2686 = vmatprep.subr.bf16.mxu0 %v4776_v30  ;;  %v4077_v10 = vsub.f32 %v3984_v8, %v4778_v48  ;;  %v4646_v48 = vand.u32 4294901760, %v4039_v56  ;;  %v4794_v30 = vand.u32 4294901760, %v3773_v17 }
  0x89   : > { %v4072_v63 = vsub.f32 %v3969_v45, %v4777_v11  ;;  %v4082_v33 = vsub.f32 %v3989_v25, %v4779_v31  ;;  %v4781_v45 = vand.u32 4294901760, %v4007_v41  ;;  %2720 = vmatpush3.bf16.msra.mxu1 %v4706_v61  ;;  %v4783_v11 = vand.u32 4294901760, %v4025_v52 }
  0x8a   : > { %2722 = vmatprep.subr.bf16.mxu1 %v4708_v9  ;;  %v4785_v61 = vand.u32 4294901760, %v3655_v32  ;;  %v4786_v31 = vand.u32 4294901760, %v3657_v62  ;;  %v4791_v9 = vand.u32 4294901760, %v3706_v43 }
  0x8b   : > { %v4094_v39 = vsub.f32 %v4007_v41, %v4781_v45  ;;  %2688 = vmatpush3.bf16.msra.mxu0 %v3584_v15  ;;  %v4107_v45 = vsub.f32 %v4025_v52, %v4783_v11  ;;  %v1250_v11 = vsub.f32 %v4039_v56, %v4646_v48  ;;  %v4792_v48 = vand.u32 4294901760, %v3737_v58 }
  0x8c   : > { %2690 = vmatprep.subr.bf16.mxu0 %v3590_v27  ;;  %v4125_v25 = vpack.c.bf16 %v4786_v31, %v4785_v61  ;;  %v4788_v27 = vand.u32 4294901760, %v3675_v7  ;;  %v4795_v56 = vand.u32 4294901760, %v3788_v20  ;;  %v4797_v61 = vand.u32 4294901760, %v3793_v16 }
  0x8d   : > { %4782 = vst [vmem:[#allocation19_spill] sm:$0xff] %v4094_v39  ;;  %4784 = vst [vmem:[#allocation44_spill] sm:$0xff] %v4107_v45  ;;  %2724 = vmatpush3.bf16.msra.mxu1 %v4712_v47  ;;  %v4138_v15 = vpack.c.bf16 %v4792_v48, %v4791_v9  ;;  %v4800_v47 = vand.u32 4294901760, %v3811_v51  ;;  %v4813_v48 = vand.u32 4294901760, %v3976_v53 }
  0x8e   : > { %4787 = vst [vmem:[#allocation45_spill] sm:$0xff] %v4125_v25  ;;  %v4131_v40 = vpack.c.bf16 %v4789_v12, %v4788_v27  ;;  %v4144_v31 = vpack.c.bf16 %v4795_v56, %v4794_v30  ;;  %v4798_v25 = vand.u32 4294901760, %v3806_v35  ;;  %v4801_v27 = vand.u32 4294901760, %v3816_v5  ;;  %2726 = vmatprep.subr.bf16.mxu1 %v4713_v59 }
  0x8f   : > { %4793 = vst [vmem:[#allocation47_spill] sm:$0xff] %v4138_v15  ;;  %2692 = vmatpush3.bf16.msra.mxu0 %v3597_v29  ;;  %v4803_v56 = vand.u32 4294901760, %v3847_v23  ;;  %v4804_v30 = vand.u32 4294901760, %v3870_v18  ;;  %v4810_v29 = vand.u32 4294901760, %v3928_v6  ;;  %v4812_v59 = vand.u32 4294901760, %v3954_v14  ;;  %v4851_v15 = vld [vmem:[#allocation23_spill] sm:$0xff] }
  0x90   : > { %4790 = vst [vmem:[#allocation46_spill] sm:$0xff] %v4131_v40  ;;  %4796 = vst [vmem:[#allocation48_spill] sm:$0xff] %v4144_v31  ;;  %v4150_v12 = vpack.c.bf16 %v4798_v25, %v4797_v61  ;;  %v4156_v40 = vpack.c.bf16 %v4801_v27, %v4800_v47  ;;  %v4806_v25 = vand.u32 4294901760, %v3881_v54  ;;  %v4807_v61 = vand.u32 4294901760, %v3888_v42  ;;  %2694 = vmatprep.subr.bf16.mxu0 %v3599_v57  ;;  %v4850_v31 = vld [vmem:[#allocation29_spill] sm:$0xff] }
  0x91   : > { %v4165_v9 = vpack.c.bf16 %v4804_v30, %v4803_v56  ;;  %v4809_v47 = vand.u32 4294901760, %v3923_v38  ;;  %v4184_v56 = vpack.c.bf16 %v4813_v48, %v4812_v59  ;;  %v4815_v30 = vand.u32 4294901760, %v4030_v19  ;;  %2728 = vmatpush3.bf16.msra.mxu1 %v4720_v60 }
  0x92   : > { %4799 = vst [vmem:[#allocation49_spill] sm:$0xff] %v4150_v12  ;;  %4802 = vst [vmem:[#allocation50_spill] sm:$0xff] %v4156_v40  ;;  %v4171_v12 = vpack.c.bf16 %v4807_v61, %v4806_v25  ;;  %v4818_v61 = vand.u32 4294901760, %v4045_v37  ;;  %v4821_v57 = vand.u32 4294901760, %v4059_v28  ;;  %v4824_v48 = vand.u32 4294901760, %v3816_v5  ;;  %2762 = vmatprep.subr.bf16.mxu1 %v3842_v46 }
  0x93   : > { %4805 = vst [vmem:[#allocation51_spill] sm:$0xff] %v4165_v9  ;;  %v4177_v27 = vpack.c.bf16 %v4810_v29, %v4809_v47  ;;  %4814 = vst [vmem:[#allocation54_spill] sm:$0xff] %v4184_v56  ;;  %v4816_v9 = vand.u32 4294901760, %v4035_v4  ;;  %v4822_v29 = vand.u32 4294901760, %v4064_v13  ;;  %v4825_v56 = vand.u32 4294901760, %v4072_v63  ;;  %2696 = vmatpush3.bf16.msra.mxu0 %v3601_v44  ;;  %v4840_v44 = vld [vmem:[#allocation7_spill] sm:$0xff] }
  0x94   : > { %4808 = vst [vmem:[#allocation52_spill] sm:$0xff] %v4171_v12  ;;  %v4819_v12 = vand.u32 4294901760, %v4050_v55  ;;  %v1302_v59 = vsub.f32 %v3816_v5, %v4824_v48  ;;  %v1282_v48 = vand.u32 4294901760, %v3893_v0  ;;  %v4837_v0 = vand.u32 4294901760, %v3870_v18  ;;  %2730 = vmatprep.subr.bf16.mxu0 %v3754_v21 }
  0x95   : > { %4811 = vst [vmem:[#allocation53_spill] sm:$0xff] %v4177_v27  ;;  %v4190_v25 = vpack.c.bf16 %v4816_v9, %v4815_v30  ;;  %v4202_v27 = vpack.c.bf16 %v4822_v29, %v4821_v57  ;;  %v4826_v9 = vand.u32 4294901760, %v4077_v10  ;;  %v4832_v57 = vand.u32 4294901760, %v4107_v45 }
  0x96   : > { %v4196_v47 = vpack.c.bf16 %v4819_v12, %v4818_v61  ;;  %v4829_v12 = vand.u32 4294901760, %v4087_v3 }
  0x97   : > { %4817 = vst [vmem:[#allocation55_spill] sm:$0xff] %v4190_v25  ;;  %4823 = vst [vmem:[#allocation57_spill] sm:$0xff] %v4202_v27  ;;  %v4211_v30 = vpack.c.bf16 %v4826_v9, %v4825_v56  ;;  %v4828_v25 = vand.u32 4294901760, %v4082_v33  ;;  %v1289_v27 = vand.u32 4294901760, %v3918_v36  ;;  %v1408_v56 = vand.u32 4294901760, %v3944_v34  ;;  %v4838_v34 = vld [vmem:[#allocation6_spill] sm:$0xff] }
  0x98   : > { %4820 = vst [vmem:[#allocation56_spill] sm:$0xff] %v4196_v47  ;;  %v4831_v47 = vand.u32 4294901760, %v4094_v39  ;;  %v1415_v9 = vand.u32 4294901760, %v3949_v2  ;;  %v1428_v36 = vsub.f32 %v3870_v18, %v4837_v0  ;;  %v4839_v2 = vand.u32 4294901760, %v4838_v34  ;;  %v4846_v34 = vld [vmem:[#allocation10_spill] sm:$0xff] }
  0x99   : > { %4827 = vst [vmem:[#allocation58_spill] sm:$0xff] %v4211_v30  ;;  %v4217_v61 = vpack.c.bf16 %v4829_v12, %v4828_v25  ;;  %v4834_v25 = vand.u32 4294901760, %v3833_v26  ;;  %v4835_v12 = vand.u32 4294901760, %v3861_v49  ;;  %v1251_v26 = vand.u32 4294901760, %v1250_v11  ;;  %v4843_v49 = vld [vmem:[#allocation40_spill] sm:$0xff] }
  0x9a   : > { %v4223_v29 = vpack.c.bf16 %v4832_v57, %v4831_v47  ;;  %v4836_v57 = vand.u32 4294901760, %v3847_v23  ;;  %v4845_v0 = vand.u32 4294901760, %v3888_v42  ;;  %v4852_v18 = vand.u32 4294901760, %v3923_v38 }
  0x9b   : > { %4830 = vst [vmem:[#allocation59_spill] sm:$0xff] %v4217_v61  ;;  %v2765_v47 = vpack.c.bf16 %v4835_v12, %v4834_v25  ;;  %v4842_v61 = vld [vmem:[#allocation15_spill] sm:$0xff]  ;;  %v1296_v25 = vand.u32 4294901760, %v4843_v49  ;;  %v1303_v12 = vand.u32 4294901760, %v1302_v59  ;;  %v2767_v49 = vpack.c.bf16 %v1289_v27, %v1282_v48 }
  0x9c   : > { %4833 = vst [vmem:[#allocation60_spill] sm:$0xff] %v4223_v29  ;;  %v1421_v60 = vsub.f32 %v3847_v23, %v4836_v57  ;;  %v4841_v29 = vand.u32 4294901760, %v4840_v44  ;;  %1146 = vmatmul.mubr.f32.vlgmr.msra.gmra.mrb[4].mxu1 %v4842_v61  ;;  %v4844_v57 = vand.u32 4294901760, %v3881_v54  ;;  %v1316_v40 = vsub.f32 %v3888_v42, %v4845_v0  ;;  %1042 = vmatmul.mubr.f32.vlgmr.msra.gmra.mrb[4].mxu0 %v4842_v61 }
  0x9d   : > { %v4847_v44 = vand.u32 4294901760, %v4846_v34  ;;  %2764 = vmatpush3.bf16.msra.mxu1 %v4850_v31  ;;  %v2769_v59 = vpack.c.bf16 %v1415_v9, %v1408_v56  ;;  %2732 = vmatpush3.bf16.msra.mxu0 %v4851_v15  ;;  %v1435_v0 = vsub.f32 %v3923_v38, %v4852_v18  ;;  %v4853_v61 = vand.u32 4294901760, %v3928_v6  ;;  %v4856_v31 = vld [vmem:[#allocation9_spill] sm:$0xff] }
  0x9e   : > { %v4247_v46 = vpack.c.bf16 %v4841_v29, %v4839_v2  ;;  %v1309_v30 = vsub.f32 %v3881_v54, %v4844_v57  ;;  %v4848_v29 = vld [vmem:[#allocation11_spill] sm:$0xff]  ;;  %2766 = vmatprep.subr.bf16.mxu1 %v2765_v47  ;;  %v1422_v57 = vand.u32 4294901760, %v1421_v60  ;;  %v1429_v54 = vand.u32 4294901760, %v1428_v36  ;;  %1252 = vmatprep.mubr.f32.mxu0 %v1251_v26 }
  0x9f   : > { %v4849_v2 = vand.u32 4294901760, %v4848_v29  ;;  %v1442_v34 = vsub.f32 %v3928_v6, %v4853_v61  ;;  %v4857_v27 = vand.u32 4294901760, %v4856_v31  ;;  %v2771_v56 = vpack.c.bf16 %v1303_v12, %v1296_v25  ;;  %1488 = vmatprep.mubr.f32.mxu1 %v4009_v50  ;;  %v4864_v12 = vld [vmem:[#allocation21_spill] sm:$0xff] }
  0xa0   : > { %2734 = vmatprep.subr.bf16.mxu0 %v4247_v46  ;;  %v1310_v9 = vand.u32 4294901760, %v1309_v30  ;;  %v1317_v47 = vand.u32 4294901760, %v1316_v40  ;;  %v4858_v18 = vand.u32 4294901760, %v3954_v14  ;;  %v4859_v36 = vand.u32 4294901760, %v3976_v53  ;;  %v4862_v40 = vld [vmem:[#allocation20_spill] sm:$0xff]  ;;  %v4868_v50 = vld [vmem:[#allocation13_spill] sm:$0xff] }
  0xa1   : > { %v4262_v11 = vpack.c.bf16 %v4849_v2, %v4847_v44  ;;  %v4854_v44 = vld [vmem:[#allocation8_spill] sm:$0xff]  ;;  %2768 = vmatpush3.bf16.msra.mxu1 %v2767_v49  ;;  %v4860_v61 = vand.u32 4294901760, %v4030_v19  ;;  %v4861_v26 = vand.u32 4294901760, %v4035_v4  ;;  %v4863_v25 = vand.u32 4294901760, %v4862_v40 }
  0xa2   : > { %v4855_v29 = vand.u32 4294901760, %v4854_v44  ;;  %v1323_v60 = vsub.f32 %v3954_v14, %v4858_v18  ;;  %v1330_v2 = vsub.f32 %v3976_v53, %v4859_v36  ;;  %v4865_v49 = vand.u32 4294901760, %v4864_v12  ;;  %2770 = vmatprep.subr.bf16.mxu1 %v2769_v59  ;;  %v4866_v36 = vld [vmem:[#allocation12_spill] sm:$0xff] }
  0xa3   : > { %v1449_v44 = vsub.f32 %v4030_v19, %v4860_v61  ;;  %v1456_v30 = vsub.f32 %v4035_v4, %v4861_v26  ;;  %2736 = vmatpush3.bf16.msra.mxu0 %v4262_v11  ;;  %v2773_v31 = vpack.c.bf16 %v1429_v54, %v1422_v57  ;;  %v1443_v18 = vand.u32 4294901760, %v1442_v34  ;;  %v4870_v26 = vld [vmem:[#allocation22_spill] sm:$0xff]  ;;  %v4872_v14 = vld [vmem:[#allocation24_spill] sm:$0xff] }
  0xa4   : > { %v4277_v48 = vpack.c.bf16 %v4857_v27, %v4855_v29  ;;  %v4297_v29 = vpack.c.bf16 %v4865_v49, %v4863_v25  ;;  %v1436_v27 = vand.u32 4294901760, %v1435_v0  ;;  %v4867_v61 = vand.u32 4294901760, %v4866_v36  ;;  %v4878_v36 = vld [vmem:[#allocation16_spill] sm:$0xff] }
  0xa5   : > { %v4869_v19 = vand.u32 4294901760, %v4868_v50  ;;  %v4871_v4 = vand.u32 4294901760, %v4870_v26  ;;  %v4873_v40 = vand.u32 4294901760, %v4872_v14  ;;  %v2775_v25 = vpack.c.bf16 %v1317_v47, %v1310_v9  ;;  %2772 = vmatpush3.bf16.msra.mxu1 %v2771_v56 }
  0xa6   : > { %2738 = vmatprep.subr.bf16.mxu0 %v4277_v48  ;;  %v4874_v59 = vand.u32 4294901760, %v4045_v37  ;;  %v4875_v57 = vand.u32 4294901760, %v4050_v55  ;;  %v1324_v34 = vand.u32 4294901760, %v1323_v60  ;;  %v1331_v50 = vand.u32 4294901760, %v1330_v2  ;;  %2774 = vmatprep.subr.bf16.mxu1 %v2773_v31  ;;  %v4880_v60 = vld [vmem:[#allocation25_spill] sm:$0xff]  ;;  %v4884_v31 = vld [vmem:[#allocation27_spill] sm:$0xff] }
  0xa7   : > { %v4304_v53 = vpack.c.bf16 %v4869_v19, %v4867_v61  ;;  %v4310_v6 = vpack.c.bf16 %v4873_v40, %v4871_v4  ;;  %v1450_v19 = vand.u32 4294901760, %v1449_v44  ;;  %v1457_v12 = vand.u32 4294901760, %v1456_v30  ;;  %2740 = vmatpush3.bf16.msra.mxu0 %v4297_v29  ;;  %v4882_v30 = vld [vmem:[#allocation26_spill] sm:$0xff] }
  0xa8   : > { %v1337_v54 = vsub.f32 %v4045_v37, %v4874_v59  ;;  %v1344_v0 = vsub.f32 %v4050_v55, %v4875_v57  ;;  %v2777_v14 = vpack.c.bf16 %v1443_v18, %v1436_v27  ;;  %v4876_v4 = vand.u32 4294901760, %v4059_v28  ;;  %v4886_v59 = vld [vmem:[#allocation14_spill] sm:$0xff] }
  0xa9   : > { %v4877_v47 = vand.u32 4294901760, %v4064_v13  ;;  %2742 = vmatprep.subr.bf16.mxu0 %v4304_v53  ;;  %v4879_v56 = vand.u32 4294901760, %v4878_v36  ;;  %v4881_v2 = vand.u32 4294901760, %v4880_v60  ;;  %v4883_v61 = vand.u32 4294901760, %v4882_v30  ;;  %2776 = vmatpush3.bf16.msra.mxu1 %v2775_v25 }
  0xaa   : > { %v1463_v9 = vsub.f32 %v4059_v28, %v4876_v4  ;;  %v4885_v27 = vand.u32 4294901760, %v4884_v31  ;;  %v1338_v26 = vand.u32 4294901760, %v1337_v54  ;;  %v1345_v40 = vand.u32 4294901760, %v1344_v0  ;;  %2778 = vmatprep.subr.bf16.mxu1 %v2777_v14 }
  0xab   : > { %v1470_v49 = vsub.f32 %v4064_v13, %v4877_v47  ;;  %v4330_v44 = vpack.c.bf16 %v4881_v2, %v4879_v56  ;;  %v4339_v57 = vand.u32 4294901760, %v4886_v59  ;;  %v2779_v4 = vpack.c.bf16 %v1331_v50, %v1324_v34  ;;  %2744 = vmatpush3.bf16.msra.mxu0 %v4310_v6 }
  0xac   : > { %v4336_v18 = vpack.c.bf16 %v4885_v27, %v4883_v61  ;;  %v2781_v47 = vpack.c.bf16 %v1457_v12, %v1450_v19  ;;  %v4887_v36 = vand.u32 4294901760, %v4072_v63  ;;  %v4888_v56 = vand.u32 4294901760, %v4077_v10  ;;  %v4892_v19 = vld [vmem:[#allocation31_spill] sm:$0xff] }
  0xad   : > { %v1464_v30 = vand.u32 4294901760, %v1463_v9  ;;  %v1471_v54 = vand.u32 4294901760, %v1470_v49  ;;  %v4889_v0 = vand.u32 4294901760, %v4082_v33  ;;  %v4890_v25 = vand.u32 4294901760, %v4087_v3  ;;  %2746 = vmatprep.subr.bf16.mxu0 %v4330_v44  ;;  %2780 = vmatpush3.bf16.msra.mxu1 %v2779_v4 }
  0xae   : > { %v1351_v60 = vsub.f32 %v4072_v63, %v4887_v36  ;;  %v1358_v2 = vsub.f32 %v4077_v10, %v4888_v56  ;;  %v4891_v50 = vand.u32 4294901760, %v3899_v22  ;;  %v4893_v12 = vand.u32 4294901760, %v4892_v19  ;;  %2782 = vmatprep.subr.bf16.mxu1 %v2781_v47  ;;  %v4903_v47 = vld [vmem:[#allocation36_spill] sm:$0xff] }
  0xaf   : > { %v1477_v61 = vsub.f32 %v4082_v33, %v4889_v0  ;;  %v1484_v34 = vsub.f32 %v4087_v3, %v4890_v25  ;;  %v2783_v27 = vpack.c.bf16 %v1345_v40, %v1338_v26  ;;  %v4363_v14 = vsub.f32 %v4886_v59, %v4339_v57  ;;  %2748 = vmatpush3.bf16.msra.mxu0 %v4336_v18  ;;  %v4897_v26 = vld [vmem:[#allocation32_spill] sm:$0xff] }
  0xb0   : > { %v4359_v31 = vpack.c.bf16 %v4893_v12, %v4891_v50  ;;  %v1352_v9 = vand.u32 4294901760, %v1351_v60  ;;  %v1359_v49 = vand.u32 4294901760, %v1358_v2  ;;  %v4894_v36 = vand.u32 4294901760, %v4094_v39  ;;  %v4899_v2 = vld [vmem:[#allocation34_spill] sm:$0xff]  ;;  %v4901_v12 = vld [vmem:[#allocation35_spill] sm:$0xff] }
  0xb1   : > { %v4895_v0 = vand.u32 4294901760, %v4107_v45  ;;  %v4896_v25 = vand.u32 4294901760, %v3933_v1  ;;  %v4898_v40 = vand.u32 4294901760, %v4897_v26  ;;  %v2785_v59 = vpack.c.bf16 %v1471_v54, %v1464_v30  ;;  %2784 = vmatpush3.bf16.msra.mxu1 %v2783_v27  ;;  %v4908_v27 = vld [vmem:[#allocation39_spill] sm:$0xff] }
  0xb2   : > { %v1365_v56 = vsub.f32 %v4094_v39, %v4894_v36  ;;  %v1478_v4 = vand.u32 4294901760, %v1477_v61  ;;  %v1485_v60 = vand.u32 4294901760, %v1484_v34  ;;  %2750 = vmatprep.subr.bf16.mxu0 %v4359_v31  ;;  %v4900_v19 = vand.u32 4294901760, %v4899_v2 }
  0xb3   : > { %v1372_v22 = vsub.f32 %v4107_v45, %v4895_v0  ;;  %v4376_v50 = vpack.c.bf16 %v4898_v40, %v4896_v25  ;;  %v4902_v36 = vand.u32 4294901760, %v4901_v12  ;;  %v1255_v0 = vand.u32 4294901760, %v4363_v14  ;;  %2786 = vmatprep.subr.bf16.mxu1 %v2785_v59  ;;  %v4906_v25 = vld [vmem:[#allocation38_spill] sm:$0xff] }
  0xb4   : > { %v2787_v1 = vpack.c.bf16 %v1359_v49, %v1352_v9  ;;  %v1366_v45 = vand.u32 4294901760, %v1365_v56  ;;  %v4904_v30 = vand.u32 4294901760, %v4903_v47  ;;  %v4905_v54 = vand.u32 4294901760, %v3984_v8  ;;  %v4920_v12 = vld [vmem:[#allocation42_spill] sm:$0xff] }
  0xb5   : > { %v4383_v39 = vpack.c.bf16 %v4902_v36, %v4900_v19  ;;  %v1373_v26 = vand.u32 4294901760, %v1372_v22  ;;  %2752 = vmatpush3.bf16.msra.mxu0 %v4376_v50  ;;  %v2789_v34 = vpack.c.bf16 %v1485_v60, %v1478_v4  ;;  %v4907_v40 = vand.u32 4294901760, %v4906_v25 }
  0xb6   : > { %v4391_v61 = vpack.c.bf16 %v4905_v54, %v4904_v30  ;;  %v4909_v2 = vand.u32 4294901760, %v4908_v27  ;;  %v1256_v9 = vsub.f32 %v4363_v14, %v1255_v0  ;;  %2788 = vmatpush3.bf16.msra.mxu1 %v2787_v1  ;;  %v4910_v8 = vand.u32 4294901760, %v4007_v41 }
  0xb7   : > { %2754 = vmatprep.subr.bf16.mxu0 %v4383_v39  ;;  %v2791_v49 = vpack.c.bf16 %v1373_v26, %v1366_v45  ;;  %v4911_v56 = vand.u32 4294901760, %v4025_v52  ;;  %2790 = vmatprep.subr.bf16.mxu1 %v2789_v34  ;;  %v2793_v59 = vpack.c.bf16 %v3657_v62, %v3655_v32  ;;  %v2795_v45 = vpack.c.bf16 %v3678_v24, %v3675_v7  ;;  %v4912_v7 = vld [vmem:[#allocation43_spill] sm:$0xff] }
  0xb8   : > { %v4398_v19 = vpack.c.bf16 %v4909_v2, %v4907_v40  ;;  %v1257_v4 = vand.u32 4294901760, %v1256_v9  ;;  %v2797_v41 = vpack.c.bf16 %v3737_v58, %v3706_v43  ;;  %v2799_v32 = vpack.c.bf16 %v3788_v20, %v3773_v17  ;;  %v4914_v58 = vld [vmem:[#allocation28_spill] sm:$0xff]  ;;  %v4915_v20 = vld [vmem:[#allocation30_spill] sm:$0xff] }
  0xb9   : > { %2756 = vmatpush3.bf16.msra.mxu0 %v4391_v61  ;;  %v4408_v22 = vpack.c.bf16 %v4911_v56, %v4910_v8  ;;  %v2801_v62 = vpack.c.bf16 %v3806_v35, %v3793_v16  ;;  %v4913_v24 = vand.u32 4294901760, %v4912_v7  ;;  %v2803_v43 = vpack.c.bf16 %v3816_v5, %v3811_v51  ;;  %v4916_v35 = vld [vmem:[#allocation17_spill] sm:$0xff] }
  0xba   : > { %2758 = vmatprep.subr.bf16.mxu0 %v4398_v19  ;;  %2792 = vmatpush3.bf16.msra.mxu1 %v2791_v49  ;;  %v2805_v17 = vpack.c.bf16 %v4914_v58, %v3847_v23  ;;  %v2807_v16 = vpack.c.bf16 %v3888_v42, %v4915_v20  ;;  %v2809_v52 = vpack.c.bf16 %v4916_v35, %v3923_v38  ;;  %v4917_v5 = vld [vmem:[#allocation33_spill] sm:$0xff]  ;;  %v4919_v23 = vld [vmem:[#allocation18_spill] sm:$0xff] }
  0xbb   : > { %2826 = vmatprep.subr.bf16.mxu1 %v3754_v21  ;;  %v4918_v51 = vld [vmem:[#allocation37_spill] sm:$0xff]  ;;  %v2813_v36 = vpack.c.bf16 %v4920_v12, %v4919_v23  ;;  %v2815_v42 = vpack.c.bf16 %v4050_v55, %v4045_v37  ;;  %v2817_v38 = vpack.c.bf16 %v4064_v13, %v4059_v28  ;;  %v2819_v1 = vpack.c.bf16 %v4077_v10, %v4072_v63  ;;  %v4921_v55 = vld [vmem:[#allocation19_spill] sm:$0xff]  ;;  %v4922_v37 = vld [vmem:[#allocation44_spill] sm:$0xff] }
  0xbc   : > { %v2811_v60 = vpack.c.bf16 %v4918_v51, %v4917_v5  ;;  %v2821_v26 = vpack.c.bf16 %v4087_v3, %v4082_v33  ;;  %v2823_v47 = vpack.c.bf16 %v4922_v37, %v4921_v55  ;;  %v4923_v13 = vld [vmem:[#allocation45_spill] sm:$0xff]  ;;  %v4924_v3 = vld [vmem:[#allocation46_spill] sm:$0xff]  ;;  %v4925_v28 = vld [vmem:[#allocation47_spill] sm:$0xff] }
  0xbd   : > { %2760 = vmatpush3.bf16.msra.mxu0 %v4408_v22  ;;  %1490 = vmatmul.mubr.f32.vlgmr.msra.gmra.mrb[6].mxu1 %v4339_v57  ;;  %v4926_v63 = vld [vmem:[#allocation41_spill] sm:$0xff]  ;;  %v4929_v33 = vld [vmem:[#allocation50_spill] sm:$0xff] }
  0xbe   : > { %2794 = vmatprep.subr.bf16.mxu0 %v2793_v59  ;;  %2828 = vmatpush3.bf16.msra.mxu1 %v4851_v15  ;;  %v4928_v10 = vld [vmem:[#allocation49_spill] sm:$0xff] }
  0xbf   : > { %2830 = vmatprep.subr.bf16.mxu1 %v4247_v46  ;;  %1732 = vmatprep.mubr.f32.mxu1 %v4913_v24 }
  0xc0   : > { %1258 = vmatmul.mubr.f32.vlgmr.msra.gmra.mrb[6].mxu0 %v1257_v4 }
  0xc1   : > { %2796 = vmatpush3.bf16.msra.mxu0 %v2795_v45  ;;  %1625 = vmatprep.mubr.f32.mxu0 %v4912_v7 }
  0xc2   : > { %2798 = vmatprep.subr.bf16.mxu0 %v2797_v41  ;;  %2832 = vmatpush3.bf16.msra.mxu1 %v4262_v11 }
  0xc3   : > { %2834 = vmatprep.subr.bf16.mxu1 %v4277_v48 }
  0xc5   : > { %2800 = vmatpush3.bf16.msra.mxu0 %v2799_v32 }
  0xc6   : > { %2802 = vmatprep.subr.bf16.mxu0 %v2801_v62  ;;  %2836 = vmatpush3.bf16.msra.mxu1 %v4297_v29 }
  0xc7   : > { %2838 = vmatprep.subr.bf16.mxu1 %v4304_v53 }
  0xc9   : > { %2804 = vmatpush3.bf16.msra.mxu0 %v2803_v43 }
  0xca   : > { %2806 = vmatprep.subr.bf16.mxu0 %v2805_v17  ;;  %2840 = vmatpush3.bf16.msra.mxu1 %v4310_v6 }
  0xcb   : > { %2842 = vmatprep.subr.bf16.mxu1 %v4330_v44 }
  0xcd   : > { %2808 = vmatpush3.bf16.msra.mxu0 %v2807_v16 }
  0xce   : > { %2810 = vmatprep.subr.bf16.mxu0 %v2809_v52  ;;  %2844 = vmatpush3.bf16.msra.mxu1 %v4336_v18 }
  0xcf   : > { %2846 = vmatprep.subr.bf16.mxu1 %v4359_v31 }
  0xd1   : > { %2812 = vmatpush3.bf16.msra.mxu0 %v2811_v60 }
  0xd2   : > { %2814 = vmatprep.subr.bf16.mxu0 %v2813_v36  ;;  %2848 = vmatpush3.bf16.msra.mxu1 %v4376_v50 }
  0xd3   : > { %2850 = vmatprep.subr.bf16.mxu1 %v4383_v39 }
  0xd5   : > { %2816 = vmatpush3.bf16.msra.mxu0 %v2815_v42 }
  0xd6   : > { %2818 = vmatprep.subr.bf16.mxu0 %v2817_v38  ;;  %2852 = vmatpush3.bf16.msra.mxu1 %v4391_v61 }
  0xd7   : > { %2854 = vmatprep.subr.bf16.mxu1 %v4398_v19 }
  0xd9   : > { %2820 = vmatpush3.bf16.msra.mxu0 %v2819_v1 }
  0xda   : > { %2822 = vmatprep.subr.bf16.mxu0 %v2821_v26  ;;  %2856 = vmatpush3.bf16.msra.mxu1 %v4408_v22 }
  0xdb   : > { %2890 = vmatprep.subr.bf16.mxu1 %v3754_v21  ;;  %v4927_v21 = vld [vmem:[#allocation48_spill] sm:$0xff] }
  0xdd   : > { %2824 = vmatpush3.bf16.msra.mxu0 %v2823_v47  ;;  %1736 = vmatmul.mubr.f32.vlgmr.msra.gmra.mrb[8].mxu1 %v1255_v0  ;;  %v266_v0 = vstv %s265_s8 }
  0xde   : > { %2858 = vmatprep.subr.bf16.mxu0 %v4923_v13  ;;  %2892 = vmatpush3.bf16.msra.mxu1 %v4851_v15  ;;  %v4930_v15 = vld [vmem:[#allocation51_spill] sm:$0xff] }
  0xdf   : > { %2894 = vmatprep.subr.bf16.mxu1 %v4247_v46  ;;  %2006 = vmatprep.mubr.f32.mxu1 %v4926_v63  ;;  %v4931_v46 = vld [vmem:[#allocation52_spill] sm:$0xff] }
  0xe0   : > { %1628 = vmatmul.mubr.f32.vlgmr.msra.gmra.mrb[8].mxu0 %v4363_v14 }
  0xe1   : > { %2860 = vmatpush3.bf16.msra.mxu0 %v4924_v3  ;;  %1902 = vmatprep.mubr.f32.mxu0 %v4926_v63 }
  0xe2   : > { %2862 = vmatprep.subr.bf16.mxu0 %v4925_v28  ;;  %2896 = vmatpush3.bf16.msra.mxu1 %v4262_v11  ;;  %v4932_v11 = vld [vmem:[#allocation53_spill] sm:$0xff] }
  0xe3   : > { %2898 = vmatprep.subr.bf16.mxu1 %v4277_v48  ;;  %v4933_v48 = vld [vmem:[#allocation54_spill] sm:$0xff] }
  0xe5   : > { %2864 = vmatpush3.bf16.msra.mxu0 %v4927_v21 }
  0xe6   : > { %2866 = vmatprep.subr.bf16.mxu0 %v4928_v10  ;;  %2900 = vmatpush3.bf16.msra.mxu1 %v4297_v29  ;;  %v4934_v29 = vld [vmem:[#allocation55_spill] sm:$0xff] }
  0xe7   : > { %2902 = vmatprep.subr.bf16.mxu1 %v4304_v53  ;;  %v4935_v53 = vld [vmem:[#allocation56_spill] sm:$0xff] }
  0xe9   : > { %2868 = vmatpush3.bf16.msra.mxu0 %v4929_v33 }
  0xea   : > { %2870 = vmatprep.subr.bf16.mxu0 %v4930_v15  ;;  %2904 = vmatpush3.bf16.msra.mxu1 %v4310_v6  ;;  %v4936_v6 = vld [vmem:[#allocation57_spill] sm:$0xff] }
  0xeb   : > { %2906 = vmatprep.subr.bf16.mxu1 %v4330_v44  ;;  %v4937_v44 = vld [vmem:[#allocation58_spill] sm:$0xff] }
  0xed   : > { %2872 = vmatpush3.bf16.msra.mxu0 %v4931_v46 }
  0xee   : > { %2874 = vmatprep.subr.bf16.mxu0 %v4932_v11  ;;  %2908 = vmatpush3.bf16.msra.mxu1 %v4336_v18  ;;  %v4938_v18 = vld [vmem:[#allocation59_spill] sm:$0xff] }
  0xef   : > { %2910 = vmatprep.subr.bf16.mxu1 %v4359_v31  ;;  %v4939_v31 = vld [vmem:[#allocation60_spill] sm:$0xff] }
  0xf1   : > { %2876 = vmatpush3.bf16.msra.mxu0 %v4933_v48 }
  0xf2   : > { %2878 = vmatprep.subr.bf16.mxu0 %v4934_v29  ;;  %2912 = vmatpush3.bf16.msra.mxu1 %v4376_v50 }
  0xf3   : > { %2914 = vmatprep.subr.bf16.mxu1 %v4383_v39 }
  0xf5   : > { %2880 = vmatpush3.bf16.msra.mxu0 %v4935_v53 }
  0xf6   : > { %2882 = vmatprep.subr.bf16.mxu0 %v4936_v6  ;;  %2916 = vmatpush3.bf16.msra.mxu1 %v4391_v61 }
  0xf7   : > { %2918 = vmatprep.subr.bf16.mxu1 %v4398_v19 }
  0xf9   : > { %2884 = vmatpush3.bf16.msra.mxu0 %v4937_v44 }
  0xfa   : > { %2886 = vmatprep.subr.bf16.mxu0 %v4938_v18  ;;  %2920 = vmatpush3.bf16.msra.mxu1 %v4408_v22 }
  0xfd   : > { %2888 = vmatpush3.bf16.msra.mxu0 %v4939_v31  ;;  %2008 = vmatmul.mubr.f32.vlgmr.msra.gmra.mrb[10].mxu1 %v4339_v57 }
 0x100   : > { %1904 = vmatmul.mubr.f32.vlgmr.msra.gmra.mrb[10].mxu0 %v4339_v57 }
 0x126   : > { %v2184_v39 = vpop.f32.mrb[0].mxu1 }
 0x127   : > { %v2185_v50 = vpop.f32.mrb[1].mxu1 }
 0x128   : > { %v2186_v54 = vadd.f32 %v2185_v50, %v2184_v39 }
 0x129   : > { %v2149_v14 = vpop.f32.mrb[0].mxu0 }
 0x12a   : > { %v2150_v30 = vpop.f32.mrb[1].mxu0 }
 0x12b   : > { %v2151_v61 = vadd.f32 %v2150_v30, %v2149_v14 }
 0x12d   : > { %v398_v34 = vadd.f32 %v2151_v61, %v266_v0 }
 0x12f   : > { %v630_v25 = vadd.f32 %v2186_v54, %v398_v34 }
 0x147   : > { %v2254_v40 = vpop.f32.mrb[2].mxu1 }
 0x148   : > { %v2255_v2 = vpop.f32.mrb[3].mxu1 }
 0x149   : > { %v2219_v27 = vpop.f32.mrb[2].mxu0  ;;  %v2256_v9 = vadd.f32 %v2255_v2, %v2254_v40 }
 0x14a   : > { %v2220_v19 = vpop.f32.mrb[3].mxu0 }
 0x14b   : > { %v2221_v49 = vadd.f32 %v2220_v19, %v2219_v27 }
 0x14d   : > { %v768_v8 = vadd.f32 %v2221_v49, %v630_v25 }
 0x14f   : > { %v876_v56 = vadd.f32 %v2256_v9, %v768_v8 }
 0x16f   : > { %v2324_v22 = vpop.f32.mrb[4].mxu1  ;;  %v2289_v57 = vpop.f32.mrb[4].mxu0 }
 0x170   : > { %v2325_v59 = vpop.f32.mrb[5].mxu1  ;;  %v2290_v4 = vpop.f32.mrb[5].mxu0 }
 0x171   : > { %v2326_v45 = vadd.f32 %v2325_v59, %v2324_v22  ;;  %v2291_v41 = vadd.f32 %v2290_v4, %v2289_v57 }
 0x173   : > { %v1044_v32 = vadd.f32 %v2291_v41, %v876_v56 }
 0x175   : > { %v1148_v62 = vadd.f32 %v2326_v45, %v1044_v32 }
 0x190   : > { %v2394_v7 = vpop.f32.mrb[6].mxu1 }
 0x191   : > { %v2395_v43 = vpop.f32.mrb[7].mxu1 }
 0x192   : > { %v2396_v17 = vadd.f32 %v2395_v43, %v2394_v7 }
 0x193   : > { %v2359_v24 = vpop.f32.mrb[6].mxu0 }
 0x194   : > { %v2360_v58 = vpop.f32.mrb[7].mxu0 }
 0x195   : > { %v2361_v20 = vadd.f32 %v2360_v58, %v2359_v24 }
 0x197   : > { %v1260_v16 = vadd.f32 %v2361_v20, %v1148_v62 }
 0x199   : > { %v1492_v35 = vadd.f32 %v2396_v17, %v1260_v16 }
 0x1b0   : > { %v2464_v52 = vpop.f32.mrb[8].mxu1 }
 0x1b1   : > { %v2465_v51 = vpop.f32.mrb[9].mxu1 }
 0x1b2   : > { %v2466_v23 = vadd.f32 %v2465_v51, %v2464_v52 }
 0x1b3   : > { %v2429_v5 = vpop.f32.mrb[8].mxu0 }
 0x1b4   : > { %v2430_v60 = vpop.f32.mrb[9].mxu0 }
 0x1b5   : > { %v2431_v12 = vadd.f32 %v2430_v60, %v2429_v5 }
 0x1b7   : > { %v1630_v36 = vadd.f32 %v2431_v12, %v1492_v35 }
 0x1b9   : > { %v1738_v42 = vadd.f32 %v2466_v23, %v1630_v36 }
 0x1d0   : > { %v2534_v38 = vpop.f32.mrb[10].mxu1 }
 0x1d1   : > { %v2535_v26 = vpop.f32.mrb[11].mxu1 }
 0x1d2   : > { %v2536_v37 = vadd.f32 %v2535_v26, %v2534_v38 }
 0x1d3   : > { %v2499_v1 = vpop.f32.mrb[10].mxu0 }
 0x1d4   : > { %v2500_v55 = vpop.f32.mrb[11].mxu0 }
 0x1d5   : > { %v2501_v47 = vadd.f32 %v2500_v55, %v2499_v1 }
 0x1d7   : > { %v1906_v13 = vadd.f32 %v2501_v47, %v1738_v42 }
 0x1d9   : > { %v2010_v3 = vadd.f32 %v2536_v37, %v1906_v13 }
 0x1db   : > { %2013 = vst [vmem:[%s189_s12] sm:$0x3] %v2010_v3 }
 0x1dc   : > { %2991 = shalt.err (!%p2988_p5)
}
 0x1dd   : > { %s2992_s30 = scalar_lea.hbm %s4508_s22, 32  ;;  %s2996_s6 = scalar_lea.hbm %s4558_s3, 64 }
 0x1de   : > { %p2993_p6 = scmp.ne.s32.totalorder %s4508_s22, %s2992_s30  ;;  %p2997_p10 = scmp.lt.u32.totalorder %s4508_s22, %s4558_s3 }
 0x1df   : > { %p2998_p11 = scmp.lt.u32.totalorder %s2996_s6, %s2992_s30  ;;  %p3000_p13 = scmp.lt.u32.totalorder %s2992_s30, %s4508_s22 }
 0x1e0   : > { %p2994_p7 = pnand %p2993_p6, %p3123_p4 }
 0x1e1   : > { %p2999_p12 = por %p2998_p11, %p2997_p10 }
 0x1e2   : > { %p2995_p9 = pneg %p2994_p7 }
 0x1e3   : > { %p3001_p0 = por %p3000_p13, %p2999_p12 }
 0x1e5   : > { %p3002_p1 = pnand %p3001_p0, %p2995_p9 }
 0x1e7   : > { %3005 = shalt.err (!%p3002_p1)
}
 0x1e8   : > { %2921 = dma.vmem_to_hbm [thread:$0]  (%p3123_p4), %s4510_s13, 32, %s4508_s22, %s2015_s24  }
 0x1e9 PF: > { %p2927_p2 = scmp.ge.s32.totalorder %s3056_s19, 2  ;;  %s2042_s9 = sand.u32 1, %s3036_s14  }
 0x1ea   : > { %s2043_s10 = scalar_lea.sflag [#allocation4], %s2042_s9 }
 0x1eb   : > { %p2924_p3 = pnand %p2927_p2, %p3130_p8 }
 0x1ed   : > { %3031 = dma.done.wait (!%p2924_p3), %s2043_s10, 32  }
 0x1ee   : > { %3033 = vsyncadd (!%p2924_p3), %s2043_s10, 4294967264  ;;  %s17_s19 = sadd.s32 1, %s3056_s19   ;;  %s4940_s14 = smov %s3040_s15 }
 0x1ef   : > { %p14_p5 = scmp.ge.s32.totalorder %s17_s19, 4   ;;  %s4941_s15 = smov %s3044_s16 }
 0x1f0   : > { %s4942_s16 = smov %s3136_s26  ;;  %s4943_s17 = smov %s3052_s18 }
 0x1f1   : > { %s4944_s18 = smov %s4946_s21  ;;  %16 = sbr.rel (!%p14_p5) target bundleno = 6 (0x6), region = 67 }
 0x1f8   :  { %2048 = vsyncpa [#allocation4], 1 }
 0x1f9   :  { %2050 = vsyncpa [#allocation4 + $0x1], 1 }

</bundles_post_ra>
